<compile_context>
chip_gen: v7x
topology: tpu7x:2x2x1
jax: 0.10.0
libtpu: 0.0.40
codegen_flags: <defaults>
</compile_context>

<pallas_src>
import functools
from math import sqrt

import jax
import jax.numpy as jnp
from jax.experimental import pallas as pl
from jax.experimental.pallas import tpu as pltpu


# ----------------------------------------------------------------------------- kernel

def _linear_kg_kernel(x_ref, e_ref, w_ref, ex_ref, red_ref, brow_ref, o_ref):
    """One node-group tile:  out = ((x @ W_bd + b_row) * (e @ E)) @ Rm.

    All operands / results are lane-dense (256 / 80 / 640 / 128 lanes); the output
    store is an unmasked 128-lane vst.
    """
    z = jnp.dot(x_ref[...], w_ref[...], preferred_element_type=jnp.float32)      # (TG, 640)
    e_exp = jnp.dot(e_ref[...], ex_ref[...], preferred_element_type=jnp.float32)  # (TG, 640)
    p = (z + brow_ref[...]) * e_exp                                                # dense VPU
    o_ref[...] = jnp.dot(p, red_ref[...],
                         preferred_element_type=jnp.float32).astype(o_ref.dtype)  # (TG, 128)


# ----------------------------------------------------------------------------- packing (hoisted)

def pack_linear_kg_weights(W, b, group=16):
    """One-time weight repack (do NOT call per forward).

    W: (R, O, I) PyTorch layout, b: (R, O) or None.
    Returns (W_bd, expand, reduce, bias_row) block-diagonal operands for group size G.
    """
    r, o, i = W.shape
    g = group
    if b is None:
        b = jnp.zeros((r, o), W.dtype)
    eye_g = jnp.eye(g, dtype=W.dtype)

    # (I, R*O): [i, r*O+o] = W[r, o, i]  ->  block-diag (G*I, G*R*O)
    w_block = jnp.transpose(W, (2, 0, 1)).reshape(i, r * o)
    w_bd = jnp.kron(eye_g, w_block)

    # edge_attr expand: (R, R*O): [r, r'*O+o] = (r == r')  ->  (G*R, G*R*O)
    e_block = jnp.repeat(jnp.eye(r, dtype=W.dtype), o, axis=1)
    expand = jnp.kron(eye_g, e_block)

    # relation fold: (R*O, O): [r*O+o, o'] = (o == o')  ->  (G*R*O, G*O)
    r_block = jnp.tile(jnp.eye(o, dtype=W.dtype), (r, 1))
    reduce_m = jnp.kron(eye_g, r_block)

    # bias broadcast row: (1, G*R*O): [0, t*R*O + r*O + o] = b[r, o]
    bias_row = jnp.tile(b.reshape(1, r * o), (1, g))
    return w_bd, expand, reduce_m, bias_row


# ----------------------------------------------------------------------------- wrapper

def linear_kg(x, edge_attr, packed, *, tile_nodes=16384, group=16, core_parallel=False):
    """Pallas LinearKG forward.

    x:         (N, I) float32
    edge_attr: (N, R) float32
    packed:    output of pack_linear_kg_weights(W, b, group)
    returns    (N, O) float32
    """
    w_bd, expand, reduce_m, bias_row = packed
    n, input_dim = x.shape
    num_rel = edge_attr.shape[1]
    rel_out = w_bd.shape[1] // group           # R*O
    out_dim = rel_out // num_rel
    assert w_bd.shape[0] == group * input_dim

    # Pad N to a multiple of the node-group size (cheap edge copy, sliced off below).
    n_pad = ((n + group - 1) // group) * group
    if n_pad != n:
        pad = n_pad - n
        x = jnp.pad(x, ((0, pad), (0, 0)))
        edge_attr = jnp.pad(edge_attr, ((0, pad), (0, 0)))
    g_total = n_pad // group

    # FREE byte-identical row-major reshapes: node axis folded onto the lane axis.
    x_view = x.reshape(g_total, group * input_dim)        # (G_total, 256)
    e_view = edge_attr.reshape(g_total, group * num_rel)  # (G_total,  80)

    # Node tile -> group-row tile (multiple of 8 sublanes when tiling).
    tg = min(g_total, max(1, tile_nodes // group))
    if tg < g_total:
        tg = max(8, (tg // 8) * 8)
    grid = (pl.cdiv(g_total, tg),)

    gi, gr, gro, go = (group * input_dim, group * num_rel,
                       group * num_rel * out_dim, group * out_dim)
    flops = 2 * g_total * (gi * gro + gr * gro + gro * go)
    bytes_accessed = 4 * (g_total * (gi + gr + go)
                          + gi * gro + gr * gro + gro * go + gro)

    # On v7x, CORE_PARALLEL actually shards the node axis across the 2 TensorCores;
    # plain "parallel" is a safe no-op everywhere else.
    semantics = (pltpu.CORE_PARALLEL,) if core_parallel else ("parallel",)

    out_view = pl.pallas_call(
        _linear_kg_kernel,
        out_shape=jax.ShapeDtypeStruct((g_total, go), x.dtype),
        grid_spec=pltpu.PrefetchScalarGridSpec(
            num_scalar_prefetch=0,
            grid=grid,
            in_specs=[
                pl.BlockSpec((tg, gi), lambda i: (i, 0)),     # x tile      (TG, 256)
                pl.BlockSpec((tg, gr), lambda i: (i, 0)),     # edge tile   (TG,  80)
                pl.BlockSpec((gi, gro), lambda i: (0, 0)),    # W_bd   (resident)
                pl.BlockSpec((gr, gro), lambda i: (0, 0)),    # expand (resident)
                pl.BlockSpec((gro, go), lambda i: (0, 0)),    # reduce (resident)
                pl.BlockSpec((1, gro), lambda i: (0, 0)),     # bias row (resident)
            ],
            out_specs=pl.BlockSpec((tg, go), lambda i: (i, 0)),   # lane-dense (TG, 128)
        ),
        compiler_params=pltpu.CompilerParams(
            dimension_semantics=semantics,
            vmem_limit_bytes=32 * 1024 * 1024,
        ),
        cost_estimate=pl.CostEstimate(flops=flops, transcendentals=0,
                                      bytes_accessed=bytes_accessed),
    )(x_view, e_view, w_bd, expand, reduce_m, bias_row)

    y = out_view.reshape(n_pad, out_dim)                  # free reshape back
    return y[:n] if n_pad != n else y


# ----------------------------------------------------------------------------- reference / init

def _xavier_uniform(key, shape):
    rf = 1
    for d in shape[2:]:
        rf *= d
    fan_in = shape[1] * rf
    fan_out = shape[0] * rf
    bound = sqrt(6.0 / (fan_in + fan_out))
    return jax.random.uniform(key, shape, jnp.float32, -bound, bound)


def linear_kg_reference(W, b, x, edge_attr):
    """Pure-JAX reference matching the PyTorch einsum semantics."""
    y = jnp.einsum('roi,ni,nr->no', W, x, edge_attr)
    if b is not None:
        y = y + edge_attr @ b
    return y


# ----------------------------------------------------------------------------- main

if __name__ == "__main__":
    relation_dim = 5          # e.g. num_relations + 1
    input_dim = 16
    output_dim = 8
    n_nodes = 200             # NOT a multiple of 16 -> exercises pad + partial-tile path

    key = jax.random.PRNGKey(0)
    kw, kb, kx, ke = jax.random.split(key, 4)

    W = _xavier_uniform(kw, (relation_dim, output_dim, input_dim))   # PyTorch (R, O, I)
    b = _xavier_uniform(kb, (relation_dim, output_dim))              # (R, O)
    x = jax.random.normal(kx, (n_nodes, input_dim), jnp.float32)
    edge_attr = jax.nn.softmax(
        jax.random.normal(ke, (n_nodes, relation_dim), jnp.float32), axis=-1)

    # Hoisted one-time weight packing (constant across forward calls).
    packed = pack_linear_kg_weights(W, b)

    # Small node tile so the demo exercises a multi-tile pipelined grid.
    y = linear_kg(x, edge_attr, packed, tile_nodes=128)
    y = jax.block_until_ready(y)

    y_ref = linear_kg_reference(W, b, x, edge_attr)
    assert y.shape == (n_nodes, output_dim)
    assert jnp.allclose(y, y_ref, atol=1e-4, rtol=1e-4), "mismatch vs reference"

    print("KERNEL_OK")
</pallas_src>

<mosaic_0001>
module attributes {stable_mosaic.version = 11 : i64} {
  func.func @_linear_kg_kernel(%arg0: i32, %arg1: memref<8x256xf32, #tpu.memory_space<vmem>>, %arg2: memref<8x80xf32, #tpu.memory_space<vmem>>, %arg3: memref<256x640xf32, #tpu.memory_space<vmem>>, %arg4: memref<80x640xf32, #tpu.memory_space<vmem>>, %arg5: memref<640x128xf32, #tpu.memory_space<vmem>>, %arg6: memref<1x640xf32, #tpu.memory_space<vmem>>, %arg7: memref<8x128xf32, #tpu.memory_space<vmem>>) attributes {dimension_semantics = [#tpu.dimension_semantics<parallel>], iteration_bounds = array<i64: 2>, scalar_prefetch = 0 : i64, scratch_operands = 0 : i64, tpu.core_type = #tpu.core_type<tc>, window_params = [{transform_indices = @transform_0, window_bounds = array<i64: 8, 256>}, {transform_indices = @transform_1, window_bounds = array<i64: 8, 80>}, {pipeline_mode = #tpu.pipeline_mode<synchronous>, transform_indices = @transform_2, window_bounds = array<i64: 256, 640>}, {pipeline_mode = #tpu.pipeline_mode<synchronous>, transform_indices = @transform_3, window_bounds = array<i64: 80, 640>}, {pipeline_mode = #tpu.pipeline_mode<synchronous>, transform_indices = @transform_4, window_bounds = array<i64: 640, 128>}, {pipeline_mode = #tpu.pipeline_mode<synchronous>, transform_indices = @transform_5, window_bounds = array<i64: 1, 640>}, {transform_indices = @transform_6, window_bounds = array<i64: 8, 128>}]} {
    %c0 = arith.constant 0 : index
    %c0_0 = arith.constant 0 : index
    %0 = vector.load %arg1[%c0, %c0_0] : memref<8x256xf32, #tpu.memory_space<vmem>>, vector<8x256xf32>
    %c0_1 = arith.constant 0 : index
    %c0_2 = arith.constant 0 : index
    %1 = vector.load %arg3[%c0_1, %c0_2] : memref<256x640xf32, #tpu.memory_space<vmem>>, vector<256x640xf32>
    %cst = arith.constant dense<0.000000e+00> : vector<8x640xf32>
    %2 = tpu.matmul %0, %1, %cst {dimension_numbers = #tpu.dot_dimension_numbers<[1], [0], [0], [1], [0, 0, 1, 1], [], []>} : vector<8x256xf32>, vector<256x640xf32>, vector<8x640xf32> -> vector<8x640xf32>
    %c0_3 = arith.constant 0 : index
    %c0_4 = arith.constant 0 : index
    %3 = vector.load %arg2[%c0_3, %c0_4] : memref<8x80xf32, #tpu.memory_space<vmem>>, vector<8x80xf32>
    %c0_5 = arith.constant 0 : index
    %c0_6 = arith.constant 0 : index
    %4 = vector.load %arg4[%c0_5, %c0_6] : memref<80x640xf32, #tpu.memory_space<vmem>>, vector<80x640xf32>
    %cst_7 = arith.constant dense<0.000000e+00> : vector<8x640xf32>
    %5 = tpu.matmul %3, %4, %cst_7 {dimension_numbers = #tpu.dot_dimension_numbers<[1], [0], [0], [1], [0, 0, 1, 1], [], []>} : vector<8x80xf32>, vector<80x640xf32>, vector<8x640xf32> -> vector<8x640xf32>
    %c0_8 = arith.constant 0 : index
    %c0_9 = arith.constant 0 : index
    %6 = vector.load %arg6[%c0_8, %c0_9] : memref<1x640xf32, #tpu.memory_space<vmem>>, vector<1x640xf32>
    %7 = vector.broadcast %6 : vector<1x640xf32> to vector<8x640xf32>
    %8 = arith.addf %2, %7 : vector<8x640xf32>
    %9 = arith.mulf %8, %5 : vector<8x640xf32>
    %c0_10 = arith.constant 0 : index
    %c0_11 = arith.constant 0 : index
    %10 = vector.load %arg5[%c0_10, %c0_11] : memref<640x128xf32, #tpu.memory_space<vmem>>, vector<640x128xf32>
    %cst_12 = arith.constant dense<0.000000e+00> : vector<8x128xf32>
    %11 = tpu.matmul %9, %10, %cst_12 {dimension_numbers = #tpu.dot_dimension_numbers<[1], [0], [0], [1], [0, 0, 1, 1], [], []>} : vector<8x640xf32>, vector<640x128xf32>, vector<8x128xf32> -> vector<8x128xf32>
    %c0_13 = arith.constant 0 : index
    %c0_14 = arith.constant 0 : index
    %12 = vector.load %arg7[%c0_13, %c0_14] : memref<8x128xf32, #tpu.memory_space<vmem>>, vector<8x128xf32>
    tpu.vector_store %arg7[%c0_13, %c0_14], %11 {strides = array<i32>} : memref<8x128xf32, #tpu.memory_space<vmem>>, vector<8x128xf32>,
    return
  }
  func.func @transform_0(%arg0: i32) -> (i32, i32) {
    %c0_i32 = arith.constant 0 : i32
    %c0_i32_0 = arith.constant 0 : i32
    return %arg0, %c0_i32 : i32, i32
  }
  func.func @transform_1(%arg0: i32) -> (i32, i32) {
    %c0_i32 = arith.constant 0 : i32
    %c0_i32_0 = arith.constant 0 : i32
    return %arg0, %c0_i32 : i32, i32
  }
  func.func @transform_2(%arg0: i32) -> (i32, i32) {
    %c0_i32 = arith.constant 0 : i32
    %c0_i32_0 = arith.constant 0 : i32
    %c0_i32_1 = arith.constant 0 : i32
    return %c0_i32, %c0_i32_0 : i32, i32
  }
  func.func @transform_3(%arg0: i32) -> (i32, i32) {
    %c0_i32 = arith.constant 0 : i32
    %c0_i32_0 = arith.constant 0 : i32
    %c0_i32_1 = arith.constant 0 : i32
    return %c0_i32, %c0_i32_0 : i32, i32
  }
  func.func @transform_4(%arg0: i32) -> (i32, i32) {
    %c0_i32 = arith.constant 0 : i32
    %c0_i32_0 = arith.constant 0 : i32
    %c0_i32_1 = arith.constant 0 : i32
    return %c0_i32, %c0_i32_0 : i32, i32
  }
  func.func @transform_5(%arg0: i32) -> (i32, i32) {
    %c0_i32 = arith.constant 0 : i32
    %c0_i32_0 = arith.constant 0 : i32
    %c0_i32_1 = arith.constant 0 : i32
    return %c0_i32, %c0_i32_0 : i32, i32
  }
  func.func @transform_6(%arg0: i32) -> (i32, i32) {
    %c0_i32 = arith.constant 0 : i32
    %c0_i32_0 = arith.constant 0 : i32
    return %arg0, %c0_i32 : i32, i32
  }
}

</mosaic_0001>

<bundles_post_ra>
// kernel: tpu_custom_call.1
= control target key start
LH: loop header
LB: loop body
LE: loop exit
PB: predicated region body
PF: predicated region fallthrough
CT: control target
= control target key end

     0   :  { %s2682_s0 = inlined_call_operand.hbm [shape: f32[13,256], index: 0, kind: input, shape index: {}]   ;;  %s2683_s1 = inlined_call_operand.hbm [shape: f32[13,80], index: 1, kind: input, shape index: {}]   ;;  %s2684_s2 = inlined_call_operand.hbm [shape: f32[256,640], index: 2, kind: input, shape index: {}]   ;;  %s2685_s3 = inlined_call_operand.hbm [shape: f32[80,640], index: 3, kind: input, shape index: {}]   ;;  %s2686_s4 = inlined_call_operand.hbm [shape: f32[640,128], index: 4, kind: input, shape index: {}]   ;;  %s2687_s5 = inlined_call_operand.vmem [shape: f32[1,640], index: 5, kind: input, shape index: {}]   ;;  %s2688_s6 = inlined_call_operand.hbm [shape: f32[13,128], index: 6, kind: output, shape index: {}]  }
   0x1   :  { %2693 = sst [smem:[#allocation17_spill]] %s2682_s0 }
   0x2   :  { %2694 = sst [smem:[#allocation18_spill]] %s2684_s2 }
   0x3   :  { %11 = vsyncpa [#allocation3], 0 }
   0x4   :  { %13 = vsyncpa [#allocation3 + $0x1], 0 }
   0x5   :  { %14 = vsyncpa [#allocation6], 0 }
   0x6   :  { %16 = vsyncpa [#allocation6 + $0x1], 0 }
   0x7   :  { %17 = vsyncpa [#allocation9], 0 }
   0x8   :  { %18 = vsyncpa [#allocation4], 0 }
   0x9   :  { %20 = vsyncpa [#allocation4 + $0x1], 0  ;;  %s2328_s21 = smov 0   ;;  %s2330_s22 = smov 0  }
   0xa   :  { %s2332_s23 = smov 0   ;;  %s2334_s24 = smov 0  }
   0xb LB: > { %s2349_s25 = sadd.s32 4294967295, %s2278_s24   ;;  %s1447_s26 = sadd.s32 4294967294, %s2278_s24   ;;  %s2278_s24 = sphi %s2334_s24, %s2718_s24   ;;  %s2274_s23 = sphi %s2332_s23, %s2717_s23   ;;  %s2270_s22 = sphi %s2330_s22, %s2716_s22   ;;  %s2266_s21 = sphi %s2328_s21, %s2715_s21  }
   0xc   : > { %p46_p0 = scmp.ne.s32.totalorder %s2270_s22, %s2266_s21  ;;  %p2689_p1 = scmp.eq.s32.totalorder %s2349_s25, 0 }
   0xd   : > { %p186_p3 = scmp.eq.s32.totalorder %s1447_s26, 1  ;;  %p1448_p5 = scmp.ge.s32.totalorder %s2278_s24, 1 }
   0xe   : > { %p2358_p4 = por %p2689_p1, %p46_p0  ;;  %p193_p7 = scmp.lt.s32.totalorder %s2278_s24, 3 }
   0xf   : > { %p2363_p6 = por %p186_p3, %p46_p0  ;;  %s2280_s30 = smov [#allocation7]  }
  0x10   : > { %s2695_s27 = scalar_select %p2358_p4, 1, 0 }
  0x11   : > { %s2696_s28 = scalar_select %p2363_p6, 1, 0 }
  0x12   : > { %p2368_p8 = pnand %p1448_p5, %p193_p7  ;;  %s205_s7 = sshll.u32 %s2280_s30, 4  ;;  %s2372_s7 = int_to_ptr.vmem [resolvable:$true] %s205_s7 }
  0x13   : > { %s2281_s9 = smov [#allocation8]   ;;  %s2282_s11 = smov [#allocation10]  }
  0x14   : > { %s2697_s29 = scalar_select %p2368_p8, 1, 0 }
  0x15   : > { %p1985_p9 = pneg %p2368_p8  ;;  %s218_s10 = sshll.u32 %s2281_s9, 4  ;;  %s2383_s10 = int_to_ptr.vmem [resolvable:$true] %s218_s10 }
  0x16   : > { %s2385_s12 = sshll.u32 %s2282_s11, 4  ;;  %s2699_s2 = sld [smem:[#allocation18_spill]]  ;;  %s232_s12 = int_to_ptr.vmem [resolvable:$true] %s2385_s12 }
  0x17   : > { %p2379_p11 = pnand %p1985_p9, %p2689_p1 }
  0x19   : > { %p2395_p13 = pneg %p2379_p11 }
  0x1c   : > { %s2056_s15 = scalar_lea.hbm %s2699_s2, 20480 }
  0x1d   : > { %p2057_p12 = scmp.ne.s32.totalorder %s2699_s2, %s2056_s15  ;;  %p2063_p5 = scmp.lt.u32.totalorder %s2056_s15, %s2699_s2 }
  0x1f   : > { %p2059_p0 = pnand %p2395_p13, %p2057_p12 }
  0x21   : > { %p2060_p3 = pneg %p2059_p0 }
  0x23   : > { %p2065_p7 = pnand %p2063_p5, %p2060_p3 }
  0x25   : > { %2068 = shalt.err (!%p2065_p7)
}
  0x26   : > { %s2069_s26 = scalar_lea.vmem %s2372_s7, 20480  ;;  %p2077_p2 = scmp.lt.s32.totalorder %s2372_s7, %s2372_s7 }
  0x27   : > { %p2070_p9 = scmp.ne.s32.totalorder %s2372_s7, %s2069_s26  ;;  %p2078_p6 = scmp.lt.s32.totalorder %s2069_s26, %s2069_s26 }
  0x29   : > { %p2072_p10 = pnand %p2070_p9, %p2395_p13  ;;  %p2079_p12 = por %p2078_p6, %p2077_p2 }
  0x2b   : > { %p2073_p1 = pneg %p2072_p10 }
  0x2d   : > { %p2080_p0 = pnand %p2079_p12, %p2073_p1 }
  0x2f   : > { %2083 = shalt.err (!%p2080_p0)
}
  0x30   : > { %s2283_s30 = smov 640   ;;  %s2284_s9 = smov 40  }
  0x31   : > { %1988 = dma.hbm_to_vmem [thread:$0]  (!%p2379_p11), %s2699_s2, 20480, %s2372_s7, [#allocation6], %s2283_s30, %s2283_s30, %s2284_s9  }
  0x32   : > { %s2084_s16 = scalar_lea.hbm %s2685_s3, 6400 }
  0x33   : > { %p2085_p2 = scmp.ne.s32.totalorder %s2685_s3, %s2084_s16  ;;  %p2091_p10 = scmp.lt.u32.totalorder %s2084_s16, %s2685_s3 }
  0x35   : > { %p2087_p1 = pnand %p2085_p2, %p2395_p13 }
  0x37   : > { %p2088_p6 = pneg %p2087_p1 }
  0x39   : > { %p2093_p3 = pnand %p2091_p10, %p2088_p6 }
  0x3b   : > { %2096 = shalt.err (!%p2093_p3)
}
  0x3c   : > { %s2097_s7 = scalar_lea.vmem %s2383_s10, 6400  ;;  %p2105_p12 = scmp.lt.s32.totalorder %s2383_s10, %s2383_s10 }
  0x3d   : > { %p2098_p5 = scmp.ne.s32.totalorder %s2383_s10, %s2097_s7  ;;  %p2106_p0 = scmp.lt.s32.totalorder %s2097_s7, %s2097_s7 }
  0x3f   : > { %p2100_p7 = pnand %p2098_p5, %p2395_p13  ;;  %p2107_p2 = por %p2106_p0, %p2105_p12 }
  0x41   : > { %p2101_p9 = pneg %p2100_p7 }
  0x43   : > { %p2108_p1 = pnand %p2107_p2, %p2101_p9 }
  0x45   : > { %2111 = shalt.err (!%p2108_p1)
}
  0x46   : > { %1991 = dma.hbm_to_vmem [thread:$0]  (!%p2379_p11), %s2685_s3, 6400, %s2383_s10, [#allocation9], %s2283_s30, %s2283_s30, %s2284_s9  }
  0x47   : > { %s2112_s16 = scalar_lea.hbm %s2686_s4, 10240 }
  0x48   : > { %p2113_p6 = scmp.ne.s32.totalorder %s2686_s4, %s2112_s16  ;;  %p2119_p5 = scmp.lt.u32.totalorder %s2112_s16, %s2686_s4 }
  0x4a   : > { %p2115_p10 = pnand %p2113_p6, %p2395_p13 }
  0x4c   : > { %p2116_p3 = pneg %p2115_p10 }
  0x4e   : > { %p2121_p7 = pnand %p2119_p5, %p2116_p3 }
  0x50   : > { %2124 = shalt.err (!%p2121_p7)
}
  0x51   : > { %s2125_s7 = scalar_lea.vmem %s232_s12, 10240  ;;  %p2133_p2 = scmp.lt.s32.totalorder %s232_s12, %s232_s12 }
  0x52   : > { %p2126_p9 = scmp.ne.s32.totalorder %s232_s12, %s2125_s7  ;;  %p2134_p1 = scmp.lt.s32.totalorder %s2125_s7, %s2125_s7 }
  0x54   : > { %p2128_p12 = pnand %p2126_p9, %p2395_p13  ;;  %p2135_p4 = por %p2134_p1, %p2133_p2 }
  0x56   : > { %p2129_p0 = pneg %p2128_p12 }
  0x58   : > { %p2136_p8 = pnand %p2135_p4, %p2129_p0 }
  0x5a   : > { %2139 = shalt.err (!%p2136_p8)
}
  0x5b   : > { %s2285_s10 = smov 128   ;;  %s2286_s18 = smov 8  }
  0x5c   : > { %1994 = dma.hbm_to_vmem [thread:$0]  (!%p2379_p11), %s2686_s4, 10240, %s232_s12, [#allocation9], %s2285_s10, %s2285_s10, %s2286_s18  }
  0x5d   : > { %s2459_s11 = sadd.s32 1, %s2278_s24   ;;  %s33_s14 = sadd.s32 1, %s2274_s23 }
  0x5e   : > { %s30_s13 = ssub.s32 %s2278_s24, %s2459_s11  ;;  %p40_p8 = scmp.ne.s32.totalorder %s2274_s23, %s2270_s22 }
  0x5f   : > { %p31_p4 = scmp.eq.s32.totalorder %s30_s13, 0  ;;  %p41_p13 = scmp.eq.s32.totalorder %s2278_s24, 0 }
  0x60   : > { %p2009_p6 = scmp.lt.s32.totalorder %s2278_s24, 2  ;;  %p2701_p3 = scmp.eq.s32.totalorder %s2349_s25, 1 }
  0x61   : > { %s2469_s15 = scalar_select %p31_p4, %s2274_s23, %s33_s14  }
  0x62   : > { %p42_p10 = por %p41_p13, %p40_p8  ;;  %p2473_p5 = por %p2701_p3, %p40_p8 }
  0x63   : > { %s2478_s16 = sand.u32 1, %s2274_s23   ;;  %s1472_s12 = sshll.u32 %s2278_s24, 8 }
  0x64   : > { %s2702_s8 = scalar_select %p2473_p5, 1, 0 }
  0x65   : > { %s1453_s17 = sshll.u32 %s2478_s16, 4  ;;  %s2703_s0 = sld [smem:[#allocation17_spill]] }
  0x66   : > { %s252_s7 = scalar_lea.vmem [#allocation2], %s1453_s17  ;;  %p2487_p11 = pnand %p2009_p6, %p42_p10 }
  0x67   : > { %s260_s10 = sshll.u32 %s252_s7, 4  ;;  %s249_s9 = scalar_lea.sflag [#allocation3], %s2478_s16  ;;  %s2491_s10 = int_to_ptr.vmem [resolvable:$true] %s260_s10 }
  0x68   : > { %p2142_p9 = pneg %p2487_p11 }
  0x6b   : > { %s2485_s26 = scalar_lea.hbm %s2703_s0, %s1472_s12  ;;  %s2145_s17 = scalar_lea.hbm %s2703_s0, 512 }
  0x6c   : > { %s2140_s13 = scalar_lea.hbm %s2485_s26, 256  ;;  %p2146_p2 = scmp.lt.u32.totalorder %s2485_s26, %s2703_s0 }
  0x6d   : > { %p2141_p7 = scmp.ne.s32.totalorder %s2485_s26, %s2140_s13  ;;  %p2147_p1 = scmp.lt.u32.totalorder %s2145_s17, %s2140_s13 }
  0x6e   : > { %p2149_p8 = scmp.lt.u32.totalorder %s2140_s13, %s2485_s26 }
  0x6f   : > { %p2143_p12 = pnand %p2142_p9, %p2141_p7  ;;  %p2148_p4 = por %p2147_p1, %p2146_p2 }
  0x71   : > { %p2144_p0 = pneg %p2143_p12  ;;  %p2150_p13 = por %p2149_p8, %p2148_p4 }
  0x73   : > { %p2151_p6 = pnand %p2150_p13, %p2144_p0 }
  0x75   : > { %2154 = shalt.err (!%p2151_p6)
}
  0x76   : > { %s2155_s7 = scalar_lea.vmem %s2491_s10, 256  ;;  %s2287_s14 = smov [#allocation2]  }
  0x77   : > { %p2156_p10 = scmp.ne.s32.totalorder %s2491_s10, %s2155_s7  ;;  %s2160_s12 = sshll.u32 %s2287_s14, 4  ;;  %s2161_s12 = int_to_ptr.vmem [resolvable:$false] %s2160_s12 }
  0x78   : > { %s2162_s19 = scalar_lea.vmem %s2161_s12, 512  ;;  %p2163_p12 = scmp.lt.s32.totalorder %s2491_s10, %s2161_s12 }
  0x79   : > { %p2158_p3 = pnand %p2156_p10, %p2142_p9  ;;  %p2164_p2 = scmp.lt.s32.totalorder %s2162_s19, %s2155_s7 }
  0x7b   : > { %p2159_p7 = pneg %p2158_p3  ;;  %p2165_p1 = por %p2164_p2, %p2163_p12 }
  0x7d   : > { %p2166_p4 = pnand %p2165_p1, %p2159_p7 }
  0x7f   : > { %2169 = shalt.err (!%p2166_p4)
}
  0x80   : > { %1998 = dma.hbm_to_vmem [thread:$0]  (!%p2487_p11), %s2485_s26, 256, %s2491_s10, %s249_s9  }
  0x81   : > { %s1456_s13 = sshll.u32 %s2478_s16, 3  ;;  %s1457_s17 = sshll.u32 %s2278_s24, 7 }
  0x82   : > { %s2525_s30 = scalar_lea.hbm %s2683_s1, %s1457_s17  ;;  %s271_s7 = scalar_lea.vmem [#allocation5], %s1456_s13 }
  0x83   : > { %s278_s12 = sshll.u32 %s271_s7, 4  ;;  %s2705_s19 = sand.u32 1, %s2278_s24   ;;  %s279_s12 = int_to_ptr.vmem [resolvable:$true] %s278_s12 }
  0x84   : > { %s268_s0 = scalar_lea.sflag [#allocation6], %s2705_s19  ;;  %s2170_s2 = scalar_lea.hbm %s2525_s30, 128 }
  0x85   : > { %p2171_p0 = scmp.ne.s32.totalorder %s2525_s30, %s2170_s2  ;;  %s2175_s10 = scalar_lea.hbm %s2683_s1, 256 }
  0x86   : > { %p2176_p6 = scmp.lt.u32.totalorder %s2525_s30, %s2683_s1  ;;  %p2177_p10 = scmp.lt.u32.totalorder %s2175_s10, %s2170_s2 }
  0x87   : > { %p2173_p8 = pnand %p2171_p0, %p2142_p9  ;;  %p2179_p7 = scmp.lt.u32.totalorder %s2170_s2, %s2525_s30 }
  0x88   : > { %p2178_p3 = por %p2177_p10, %p2176_p6 }
  0x89   : > { %p2174_p13 = pneg %p2173_p8 }
  0x8a   : > { %p2180_p12 = por %p2179_p7, %p2178_p3 }
  0x8c   : > { %p2181_p2 = pnand %p2180_p12, %p2174_p13 }
  0x8e   : > { %2184 = shalt.err (!%p2181_p2)
}
  0x8f   : > { %s2185_s13 = scalar_lea.vmem %s279_s12, 128  ;;  %s2288_s20 = smov [#allocation5]  }
  0x90   : > { %p2186_p1 = scmp.ne.s32.totalorder %s279_s12, %s2185_s13  ;;  %s2190_s14 = sshll.u32 %s2288_s20, 4  ;;  %s2191_s14 = int_to_ptr.vmem [resolvable:$false] %s2190_s14 }
  0x91   : > { %s2192_s7 = scalar_lea.vmem %s2191_s14, 256  ;;  %p2193_p8 = scmp.lt.s32.totalorder %s279_s12, %s2191_s14 }
  0x92   : > { %p2188_p4 = pnand %p2186_p1, %p2142_p9  ;;  %p2194_p5 = scmp.lt.s32.totalorder %s2192_s7, %s2185_s13 }
  0x94   : > { %p2189_p0 = pneg %p2188_p4  ;;  %p2195_p6 = por %p2194_p5, %p2193_p8 }
  0x96   : > { %p2196_p10 = pnand %p2195_p6, %p2189_p0 }
  0x98   : > { %2199 = shalt.err (!%p2196_p10)
}
  0x99   : > { %2001 = dma.hbm_to_vmem [thread:$0]  (!%p2487_p11), %s2525_s30, 128, %s279_s12, %s268_s0  }
  0x9a   : > { %p2706_p13 = scmp.ne.s32.totalorder %s2697_s29, 0 }
  0x9b   : > { %s2551_s2 = sand.u32 (!%p2706_p13), 1, %s2270_s22   ;;  %p2707_p5 = scmp.ne.s32.totalorder (!%p2706_p13), %s2695_s27, 0 }
  0x9c   : > { %287 = sbr.rel (%p2706_p13) target bundleno = 741 (0x2e5), region = 44  ;;  %s1459_s19 = sshll.u32 (!%p2706_p13), %s2551_s2, 4 }
  0x9d   : > { %s290_s16 = scalar_lea.sflag (!%p2706_p13), [#allocation3], %s2551_s2  ;;  %s2555_s26 = scalar_lea.vmem (!%p2706_p13), [#allocation2], %s1459_s19 }
  0xa3   : > { %2245 = dma.done.wait (%p2707_p5), %s290_s16, 256  }
  0xa4   : > { %2247 = vsyncadd (%p2707_p5), %s290_s16, 4294967040  ;;  %s298_s0 = sand.u32 1, %s2349_s25   ;;  %s1460_s29 = sshll.u32 %s2551_s2, 3 }
  0xa5   : > { %s299_s18 = scalar_lea.sflag [#allocation6], %s298_s0  ;;  %s2565_s30 = scalar_lea.vmem [#allocation5], %s1460_s29 }
  0xa6   : > { %2249 = dma.done.wait (%p2707_p5), %s299_s18, 128  }
  0xa7   : > { %2251 = vsyncadd (%p2707_p5), %s299_s18, 4294967168  ;;  %p2708_p11 = scmp.eq.s32.totalorder %s2349_s25, 0 }
  0xa9   : > { %2253 = dma.done.wait (%p2708_p11), [#allocation6], 20480   ;;  %p2709_p9 = pmov %p2708_p11 }
  0xab   : > { %2255 = vsyncadd (%p2709_p9), [#allocation6], 4294946816  ;;  %p2710_p3 = pmov %p2709_p9 }
  0xad   : > { %2257 = dma.done.wait (%p2710_p3), [#allocation9], 16640   ;;  %p2711_p7 = pmov %p2710_p3 }
  0xae   : > { %v2289_v0 = vmov 0.0   ;;  %v512_v1 = vld [vmem:[#allocation8 + $0x8] sm:$0xff]  ;;  %v517_v2 = vld [vmem:[#allocation8 + $0x30] sm:$0xff]  ;;  %v514_v3 = vld [vmem:[#allocation8 + $0x18] sm:$0xff]  ;;  %vm561_vm0 = vcmask 654336   ;;  %vm2291_vm1 = vmmov 0  }
  0xaf   : > { %2259 = vsyncadd (%p2711_p7), [#allocation9], 4294950656  ;;  %700 = vmatprep.mubr.f32.mxu1 %v2289_v0  ;;  %629 = vmatprep.mubr.f32.mxu0 %v2289_v0  ;;  %v1664_v4 = vpack.c.bf16 %v517_v2, %v512_v1  ;;  %v519_v5 = vld [vmem:[#allocation8 + $0x40] sm:$0xff]  ;;  %v516_v7 = vld [vmem:[#allocation8 + $0x28] sm:$0xff]  ;;  %s1469_s10 = sshll.u32 %s2349_s25, 7  ;;  %s347_s9 = scalar_lea.vmem [#allocation11], %s1460_s29 }
  0xb0   : > { %v511_v6 = vld [vmem:[#allocation8] sm:$0xff]  ;;  %v1684_v8 = vpack.c.bf16 %v519_v5, %v514_v3  ;;  %v513_v10 = vld [vmem:[#allocation8 + $0x10] sm:$0xff]  ;;  %v518_v11 = vld [vmem:[#allocation8 + $0x38] sm:$0xff]  ;;  %s1326_s17 = sshll.u32 %s347_s9, 4  ;;  %s2638_s14 = scalar_lea.hbm %s2688_s6, %s1469_s10  ;;  %s2640_s17 = int_to_ptr.vmem [resolvable:$true] %s1326_s17 }
  0xb1   : > { %v1666_v9 = vpack.c.bf16 %v516_v7, %v511_v6  ;;  %v522_v12 = vld [vmem:[#allocation8 + $0x58] sm:$0xff]  ;;  %1665 = vmatprep.subr.bf16.mxu0 %v1664_v4  ;;  %v1686_v13 = vpack.c.bf16 %v518_v11, %v513_v10  ;;  %v527_v14 = vld [vmem:[#allocation8 + $0x80] sm:$0xff]  ;;  %v524_v15 = vld [vmem:[#allocation8 + $0x68] sm:$0xff]  ;;  %s1313_s7 = scalar_lea.sflag [#allocation4], %s2551_s2  ;;  %s2200_s19 = scalar_lea.vmem %s2640_s17, 128 }
  0xb2   : > { %v529_v16 = vld [vmem:[#allocation8 + $0x90] sm:$0xff]  ;;  %1685 = vmatprep.subr.bf16.mxu1 %v1684_v8  ;;  %v1668_v17 = vpack.c.bf16 %v527_v14, %v522_v12  ;;  %v526_v20 = vld [vmem:[#allocation8 + $0x78] sm:$0xff]  ;;  %v523_v21 = vld [vmem:[#allocation8 + $0x60] sm:$0xff]  ;;  %p2201_p12 = scmp.ne.s32.totalorder %s2640_s17, %s2200_s19  ;;  %p2712_p2 = scmp.ne.s32.totalorder %s2702_s8, 0 }
  0xb3   : > { %1667 = vmatpush1.bf16.msra.mxu0 %v1666_v9  ;;  %v1688_v18 = vpack.c.bf16 %v529_v16, %v524_v15  ;;  %v521_v19 = vld [vmem:[#allocation8 + $0x50] sm:$0xff]  ;;  %1687 = vmatpush1.bf16.msra.mxu1 %v1686_v13  ;;  %v528_v23 = vld [vmem:[#allocation8 + $0x88] sm:$0xff]  ;;  %v534_v28 = vld [vmem:[#allocation8 + $0xb8] sm:$0xff]  ;;  %v2290_v9 = vmov 0.0|0.0   ;;  %s2292_s25 = smov [#allocation11]  }
  0xb4   : > { %v1670_v22 = vpack.c.bf16 %v526_v20, %v521_v19  ;;  %v532_v24 = vld [vmem:[#allocation8 + $0xa8] sm:$0xff]  ;;  %v537_v25 = vld [vmem:[#allocation8 + $0xd0] sm:$0xff]  ;;  %1669 = vmatprep.subr.bf16.mxu0 %v1668_v17  ;;  %v1690_v26 = vpack.c.bf16 %v528_v23, %v523_v21  ;;  %v539_v29 = vld [vmem:[#allocation8 + $0xe0] sm:$0xff]  ;;  %p2202_p1 = pnand %p2201_p12, %p2712_p2  ;;  %s2204_s16 = sshll.u32 %s2292_s25, 4  ;;  %s2205_s16 = int_to_ptr.vmem [resolvable:$false] %s2204_s16 }
  0xb5   : > { %1689 = vmatprep.subr.bf16.mxu1 %v1688_v18  ;;  %v1672_v27 = vpack.c.bf16 %v537_v25, %v532_v24  ;;  %v531_v30 = vld [vmem:[#allocation8 + $0xa0] sm:$0xff]  ;;  %v1692_v31 = vpack.c.bf16 %v539_v29, %v534_v28  ;;  %v536_v32 = vld [vmem:[#allocation8 + $0xc8] sm:$0xff]  ;;  %v533_v33 = vld [vmem:[#allocation8 + $0xb0] sm:$0xff]  ;;  %p2207_p0 = scmp.lt.s32.totalorder %s2640_s17, %s2205_s16 }
  0xb6   : > { %v538_v34 = vld [vmem:[#allocation8 + $0xd8] sm:$0xff]  ;;  %v1674_v35 = vpack.c.bf16 %v536_v32, %v531_v30  ;;  %v547_v37 = vld [vmem:[#allocation8 + $0x120] sm:$0xff]  ;;  %v544_v38 = vld [vmem:[#allocation8 + $0x108] sm:$0xff]  ;;  %p2203_p4 = pneg %p2202_p1 }
  0xb7   : > { %1671 = vmatpush1.bf16.msra.mxu0 %v1670_v22  ;;  %v542_v36 = vld [vmem:[#allocation8 + $0xf8] sm:$0xff]  ;;  %1691 = vmatpush1.bf16.msra.mxu1 %v1690_v26  ;;  %v1694_v39 = vpack.c.bf16 %v538_v34, %v533_v33  ;;  %v549_v41 = vld [vmem:[#allocation8 + $0x130] sm:$0xff]  ;;  %v543_v45 = vld [vmem:[#allocation8 + $0x100] sm:$0xff] }
  0xb8   : > { %1673 = vmatprep.subr.bf16.mxu0 %v1672_v27  ;;  %v1676_v40 = vpack.c.bf16 %v547_v37, %v542_v36  ;;  %v541_v42 = vld [vmem:[#allocation8 + $0xf0] sm:$0xff]  ;;  %v546_v43 = vld [vmem:[#allocation8 + $0x118] sm:$0xff]  ;;  %1693 = vmatprep.subr.bf16.mxu1 %v1692_v31  ;;  %v1696_v44 = vpack.c.bf16 %v549_v41, %v544_v38  ;;  %v548_v46 = vld [vmem:[#allocation8 + $0x128] sm:$0xff] }
  0xb9   : > { %v552_v47 = vld [vmem:[#allocation8 + $0x148] sm:$0xff]  ;;  %v557_v48 = vld [vmem:[#allocation8 + $0x170] sm:$0xff]  ;;  %v554_v49 = vld [vmem:[#allocation8 + $0x158] sm:$0xff]  ;;  %v1678_v51 = vpack.c.bf16 %v546_v43, %v541_v42  ;;  %v1698_v52 = vpack.c.bf16 %v548_v46, %v543_v45 }
  0xba   : > { %v559_v50 = vld [vmem:[#allocation8 + $0x180] sm:$0xff]  ;;  %v1680_v53 = vpack.c.bf16 %v557_v48, %v552_v47  ;;  %v556_v55 = vld [vmem:[#allocation8 + $0x168] sm:$0xff]  ;;  %v553_v57 = vld [vmem:[#allocation8 + $0x150] sm:$0xff] }
  0xbb   : > { %1675 = vmatpush1.bf16.msra.mxu0 %v1674_v35  ;;  %1695 = vmatpush1.bf16.msra.mxu1 %v1694_v39  ;;  %v551_v54 = vld [vmem:[#allocation8 + $0x140] sm:$0xff]  ;;  %v1700_v56 = vpack.c.bf16 %v559_v50, %v554_v49  ;;  %v558_v58 = vld [vmem:[#allocation8 + $0x178] sm:$0xff]  ;;  %v351_v59 = vld [vmem:[#allocation7 + $0x8] sm:$0xff] }
  0xbc   : > { %1677 = vmatprep.subr.bf16.mxu0 %v1676_v40  ;;  %1697 = vmatprep.subr.bf16.mxu1 %v1696_v44  ;;  %v356_v60 = vld [vmem:[#allocation7 + $0x30] sm:$0xff]  ;;  %v1682_v61 = vpack.c.bf16 %v556_v55, %v551_v54  ;;  %v1702_v62 = vpack.c.bf16 %v558_v58, %v553_v57  ;;  %v515_v63 = vld [vmem:[#allocation8 + $0x20] sm:$0xff]  ;;  %v520_v1 = vld [vmem:[#allocation8 + $0x48] sm:$0xff] }
  0xbd   : > { %v1719_v2 = vpack.c.bf16 %v356_v60, %v351_v59  ;;  %v350_v3 = vld [vmem:[#allocation7] sm:$0xff]  ;;  %v355_v4 = vld [vmem:[#allocation7 + $0x28] sm:$0xff]  ;;  %v361_v5 = vld [vmem:[#allocation7 + $0x58] sm:$0xff]  ;;  %v1705_v8 = vpack.c.bf16 %v520_v1, %v515_v63 }
  0xbe   : > { %v366_v6 = vld [vmem:[#allocation7 + $0x80] sm:$0xff]  ;;  %v2582_v7 = vld [vmem:[%s2565_s30] sm:$0xff]  ;;  %v1721_v10 = vpack.c.bf16 %v355_v4, %v350_v3  ;;  %v371_v16 = vld [vmem:[#allocation7 + $0xa8] sm:$0xff] }
  0xbf   : > { %1679 = vmatpush1.bf16.msra.mxu0 %v1678_v51  ;;  %1699 = vmatpush1.bf16.msra.mxu1 %v1698_v52  ;;  %v525_v11 = vld [vmem:[#allocation8 + $0x70] sm:$0xff]  ;;  %v530_v12 = vld [vmem:[#allocation8 + $0x98] sm:$0xff]  ;;  %v1723_v13 = vpack.c.bf16 %v366_v6, %v361_v5  ;;  %v535_v20 = vld [vmem:[#allocation8 + $0xc0] sm:$0xff] }
  0xc0   : > { %1681 = vmatprep.subr.bf16.mxu0 %v1680_v53  ;;  %1701 = vmatprep.subr.bf16.mxu1 %v1700_v56  ;;  %v360_v14 = vld [vmem:[#allocation7 + $0x50] sm:$0xff]  ;;  %v365_v15 = vld [vmem:[#allocation7 + $0x78] sm:$0xff]  ;;  %v1708_v18 = vpack.c.bf16 %v530_v12, %v525_v11  ;;  %v540_v21 = vld [vmem:[#allocation8 + $0xe8] sm:$0xff] }
  0xc1   : > { %v376_v17 = vld [vmem:[#allocation7 + $0xd0] sm:$0xff]  ;;  %v1725_v19 = vpack.c.bf16 %v365_v15, %v360_v14  ;;  %v370_v23 = vld [vmem:[#allocation7 + $0xa0] sm:$0xff]  ;;  %v375_v24 = vld [vmem:[#allocation7 + $0xc8] sm:$0xff]  ;;  %v1711_v27 = vpack.c.bf16 %v540_v21, %v535_v20 }
  0xc2   : > { %v1727_v22 = vpack.c.bf16 %v376_v17, %v371_v16  ;;  %v381_v25 = vld [vmem:[#allocation7 + $0xf8] sm:$0xff]  ;;  %v386_v26 = vld [vmem:[#allocation7 + $0x120] sm:$0xff]  ;;  %v1729_v28 = vpack.c.bf16 %v375_v24, %v370_v23  ;;  %v545_v29 = vld [vmem:[#allocation8 + $0x110] sm:$0xff] }
  0xc3   : > { %1683 = vmatpush1.bf16.msra.mxu0 %v1682_v61  ;;  %1703 = vmatpush1.bf16.msra.mxu1 %v1702_v62  ;;  %v550_v30 = vld [vmem:[#allocation8 + $0x138] sm:$0xff]  ;;  %v1731_v31 = vpack.c.bf16 %v386_v26, %v381_v25  ;;  %v380_v32 = vld [vmem:[#allocation7 + $0xf0] sm:$0xff]  ;;  %v391_v34 = vld [vmem:[#allocation7 + $0x148] sm:$0xff] }
  0xc4   : > { %1704 = vmatprep.subr.bf16.mxu0 %v2290_v9  ;;  %1720 = vmatprep.subr.bf16.mxu1 %v1719_v2  ;;  %v385_v33 = vld [vmem:[#allocation7 + $0x118] sm:$0xff]  ;;  %v396_v35 = vld [vmem:[#allocation7 + $0x170] sm:$0xff]  ;;  %v1714_v36 = vpack.c.bf16 %v550_v30, %v545_v29  ;;  %v555_v38 = vld [vmem:[#allocation8 + $0x160] sm:$0xff] }
  0xc5   : > { %v1733_v37 = vpack.c.bf16 %v385_v33, %v380_v32  ;;  %v560_v39 = vld [vmem:[#allocation8 + $0x188] sm:$0xff]  ;;  %v390_v40 = vld [vmem:[#allocation7 + $0x140] sm:$0xff]  ;;  %v1735_v41 = vpack.c.bf16 %v396_v35, %v391_v34  ;;  %v353_v43 = vld [vmem:[#allocation7 + $0x18] sm:$0xff] }
  0xc6   : > { %1465 = vmatmul.mubr.msk.f32.vlgmr.msra.gmra.mrb[0].mxu0 %vm561_vm0, %v2582_v7  ;;  %1466 = vmatmul.mubr.msk.f32.vlgmr.msra.gmra.mrb[0].mxu1 %vm561_vm0, %v2582_v7  ;;  %v395_v42 = vld [vmem:[#allocation7 + $0x168] sm:$0xff]  ;;  %v358_v44 = vld [vmem:[#allocation7 + $0x40] sm:$0xff]  ;;  %v401_v45 = vld [vmem:[#allocation7 + $0x198] sm:$0xff]  ;;  %v1717_v47 = vpack.c.bf16 %v560_v39, %v555_v38 }
  0xc7   : > { %1706 = vmatpush3.bf16.msra.mxu0 %v1705_v8  ;;  %1722 = vmatpush1.bf16.msra.mxu1 %v1721_v10  ;;  %v406_v46 = vld [vmem:[#allocation7 + $0x1c0] sm:$0xff]  ;;  %v1737_v48 = vpack.c.bf16 %v395_v42, %v390_v40  ;;  %v1783_v49 = vpack.c.bf16 %v358_v44, %v353_v43  ;;  %v400_v50 = vld [vmem:[#allocation7 + $0x190] sm:$0xff]  ;;  %v357_v52 = vld [vmem:[#allocation7 + $0x38] sm:$0xff] }
  0xc8   : > { %1707 = vmatprep.subr.bf16.mxu0 %v2290_v9  ;;  %1724 = vmatprep.subr.bf16.mxu1 %v1723_v13  ;;  %v352_v51 = vld [vmem:[#allocation7 + $0x10] sm:$0xff]  ;;  %v1739_v53 = vpack.c.bf16 %v406_v46, %v401_v45  ;;  %v405_v54 = vld [vmem:[#allocation7 + $0x1b8] sm:$0xff]  ;;  %v363_v55 = vld [vmem:[#allocation7 + $0x68] sm:$0xff] }
  0xc9   : > { %1626 = vmatprep.mubr.msk.f32.mxu0 %vm2291_vm1, %v2289_v0  ;;  %v368_v56 = vld [vmem:[#allocation7 + $0x90] sm:$0xff]  ;;  %v411_v57 = vld [vmem:[#allocation7 + $0x1e8] sm:$0xff]  ;;  %v1785_v59 = vpack.c.bf16 %v357_v52, %v352_v51  ;;  %v1741_v60 = vpack.c.bf16 %v405_v54, %v400_v50  ;;  %v410_v62 = vld [vmem:[#allocation7 + $0x1e0] sm:$0xff] }
  0xca   : > { %v416_v58 = vld [vmem:[#allocation7 + $0x210] sm:$0xff]  ;;  %v1787_v61 = vpack.c.bf16 %v368_v56, %v363_v55  ;;  %v362_v63 = vld [vmem:[#allocation7 + $0x60] sm:$0xff]  ;;  %v367_v1 = vld [vmem:[#allocation7 + $0x88] sm:$0xff] }
  0xcb   : > { %1709 = vmatpush3.bf16.msra.mxu0 %v1708_v18  ;;  %1726 = vmatpush1.bf16.msra.mxu1 %v1725_v19  ;;  %v1743_v2 = vpack.c.bf16 %v416_v58, %v411_v57  ;;  %v415_v3 = vld [vmem:[#allocation7 + $0x208] sm:$0xff]  ;;  %v373_v4 = vld [vmem:[#allocation7 + $0xb8] sm:$0xff]  ;;  %v378_v5 = vld [vmem:[#allocation7 + $0xe0] sm:$0xff]  ;;  %v1789_v10 = vpack.c.bf16 %v367_v1, %v362_v63 }
  0xcc   : > { %1710 = vmatprep.subr.bf16.mxu0 %v2290_v9  ;;  %1728 = vmatprep.subr.bf16.mxu1 %v1727_v22  ;;  %v421_v6 = vld [vmem:[#allocation7 + $0x238] sm:$0xff]  ;;  %v426_v8 = vld [vmem:[#allocation7 + $0x260] sm:$0xff]  ;;  %v1745_v11 = vpack.c.bf16 %v415_v3, %v410_v62  ;;  %v1791_v12 = vpack.c.bf16 %v378_v5, %v373_v4  ;;  %v420_v13 = vld [vmem:[#allocation7 + $0x230] sm:$0xff] }
  0xcd   : > { %v372_v14 = vld [vmem:[#allocation7 + $0xb0] sm:$0xff]  ;;  %v377_v15 = vld [vmem:[#allocation7 + $0xd8] sm:$0xff]  ;;  %v1747_v16 = vpack.c.bf16 %v426_v8, %v421_v6  ;;  %v383_v18 = vld [vmem:[#allocation7 + $0x108] sm:$0xff] }
  0xce   : > { %v425_v17 = vld [vmem:[#allocation7 + $0x258] sm:$0xff]  ;;  %v388_v19 = vld [vmem:[#allocation7 + $0x130] sm:$0xff]  ;;  %v431_v20 = vld [vmem:[#allocation7 + $0x288] sm:$0xff] }
  0xcf   : > { %1712 = vmatpush3.bf16.msra.mxu0 %v1711_v27  ;;  %1730 = vmatpush1.bf16.msra.mxu1 %v1729_v28  ;;  %v436_v21 = vld [vmem:[#allocation7 + $0x2b0] sm:$0xff]  ;;  %v1749_v22 = vpack.c.bf16 %v425_v17, %v420_v13  ;;  %v1795_v23 = vpack.c.bf16 %v388_v19, %v383_v18  ;;  %v430_v24 = vld [vmem:[#allocation7 + $0x280] sm:$0xff]  ;;  %v387_v26 = vld [vmem:[#allocation7 + $0x128] sm:$0xff] }
  0xd0   : > { %1713 = vmatprep.subr.bf16.mxu0 %v2290_v9  ;;  %1732 = vmatprep.subr.bf16.mxu1 %v1731_v31  ;;  %v382_v25 = vld [vmem:[#allocation7 + $0x100] sm:$0xff]  ;;  %v1751_v27 = vpack.c.bf16 %v436_v21, %v431_v20  ;;  %v435_v28 = vld [vmem:[#allocation7 + $0x2a8] sm:$0xff]  ;;  %v393_v29 = vld [vmem:[#allocation7 + $0x158] sm:$0xff] }
  0xd1   : > { %v398_v30 = vld [vmem:[#allocation7 + $0x180] sm:$0xff]  ;;  %v441_v31 = vld [vmem:[#allocation7 + $0x2d8] sm:$0xff]  ;;  %v1797_v33 = vpack.c.bf16 %v387_v26, %v382_v25  ;;  %v440_v34 = vld [vmem:[#allocation7 + $0x2d0] sm:$0xff]  ;;  %v1753_v35 = vpack.c.bf16 %v435_v28, %v430_v24 }
  0xd2   : > { %v446_v32 = vld [vmem:[#allocation7 + $0x300] sm:$0xff]  ;;  %v397_v38 = vld [vmem:[#allocation7 + $0x178] sm:$0xff]  ;;  %v403_v42 = vld [vmem:[#allocation7 + $0x1a8] sm:$0xff] }
  0xd3   : > { %1715 = vmatpush3.bf16.msra.mxu0 %v1714_v36  ;;  %1734 = vmatpush1.bf16.msra.mxu1 %v1733_v37  ;;  %v1799_v36 = vpack.c.bf16 %v398_v30, %v393_v29  ;;  %v392_v37 = vld [vmem:[#allocation7 + $0x150] sm:$0xff]  ;;  %v2598_v39 = vld [vmem:[%s2555_s26 + $0x8] sm:$0xff]  ;;  %v1755_v40 = vpack.c.bf16 %v446_v32, %v441_v31  ;;  %v402_v50 = vld [vmem:[#allocation7 + $0x1a0] sm:$0xff] }
  0xd4   : > { %1716 = vmatprep.subr.bf16.mxu0 %v2290_v9  ;;  %1736 = vmatprep.subr.bf16.mxu1 %v1735_v41  ;;  %v445_v41 = vld [vmem:[#allocation7 + $0x2f8] sm:$0xff]  ;;  %v408_v43 = vld [vmem:[#allocation7 + $0x1d0] sm:$0xff]  ;;  %v451_v44 = vld [vmem:[#allocation7 + $0x328] sm:$0xff]  ;;  %v1801_v46 = vpack.c.bf16 %v397_v38, %v392_v37 }
  0xd5   : > { %868 = vmatprep.mubr.f32.mxu1 %v2598_v39  ;;  %v456_v45 = vld [vmem:[#allocation7 + $0x350] sm:$0xff]  ;;  %v407_v51 = vld [vmem:[#allocation7 + $0x1c8] sm:$0xff]  ;;  %v413_v54 = vld [vmem:[#allocation7 + $0x1f8] sm:$0xff] }
  0xd6   : > { %v1759_v52 = vpack.c.bf16 %v456_v45, %v451_v44  ;;  %v418_v55 = vld [vmem:[#allocation7 + $0x220] sm:$0xff]  ;;  %v461_v56 = vld [vmem:[#allocation7 + $0x378] sm:$0xff]  ;;  %v1805_v58 = vpack.c.bf16 %v407_v51, %v402_v50  ;;  %v412_v62 = vld [vmem:[#allocation7 + $0x1f0] sm:$0xff] }
  0xd7   : > { %1718 = vmatpush3.bf16.msra.mxu0 %v1717_v47  ;;  %1738 = vmatpush1.bf16.msra.mxu1 %v1737_v48  ;;  %v1757_v47 = vpack.c.bf16 %v445_v41, %v440_v34  ;;  %v1803_v48 = vpack.c.bf16 %v408_v43, %v403_v42  ;;  %v466_v57 = vld [vmem:[#allocation7 + $0x3a0] sm:$0xff]  ;;  %v417_v63 = vld [vmem:[#allocation7 + $0x218] sm:$0xff]  ;;  %v423_v3 = vld [vmem:[#allocation7 + $0x248] sm:$0xff] }
  0xd8   : > { %1784 = vmatprep.subr.bf16.mxu0 %v1783_v49  ;;  %1740 = vmatprep.subr.bf16.mxu1 %v1739_v53  ;;  %v450_v49 = vld [vmem:[#allocation7 + $0x320] sm:$0xff]  ;;  %v455_v53 = vld [vmem:[#allocation7 + $0x348] sm:$0xff]  ;;  %v1763_v1 = vpack.c.bf16 %v466_v57, %v461_v56  ;;  %v428_v4 = vld [vmem:[#allocation7 + $0x270] sm:$0xff]  ;;  %v1809_v8 = vpack.c.bf16 %v417_v63, %v412_v62 }
  0xd9   : > { %v471_v5 = vld [vmem:[#allocation7 + $0x3c8] sm:$0xff]  ;;  %v476_v6 = vld [vmem:[#allocation7 + $0x3f0] sm:$0xff]  ;;  %v422_v13 = vld [vmem:[#allocation7 + $0x240] sm:$0xff] }
  0xda   : > { %1627 = vmatmul.mubr.msk.f32.vlgmr.msra.gmra.mrb[2].mxu0 %vm561_vm0, %v2582_v7  ;;  %v1793_v7 = vpack.c.bf16 %v377_v15, %v372_v14  ;;  %v427_v14 = vld [vmem:[#allocation7 + $0x268] sm:$0xff]  ;;  %v1767_v15 = vpack.c.bf16 %v476_v6, %v471_v5  ;;  %v433_v17 = vld [vmem:[#allocation7 + $0x298] sm:$0xff]  ;;  %v438_v18 = vld [vmem:[#allocation7 + $0x2c0] sm:$0xff] }
  0xdb   : > { %1786 = vmatpush1.bf16.msra.mxu0 %v1785_v59  ;;  %1742 = vmatpush1.bf16.msra.mxu1 %v1741_v60  ;;  %v1761_v59 = vpack.c.bf16 %v455_v53, %v450_v49  ;;  %v1807_v60 = vpack.c.bf16 %v418_v55, %v413_v54  ;;  %v481_v19 = vld [vmem:[#allocation7 + $0x418] sm:$0xff]  ;;  %v486_v20 = vld [vmem:[#allocation7 + $0x440] sm:$0xff]  ;;  %v1813_v21 = vpack.c.bf16 %v427_v14, %v422_v13  ;;  %v432_v24 = vld [vmem:[#allocation7 + $0x290] sm:$0xff] }
  0xdc   : > { %1788 = vmatprep.subr.bf16.mxu0 %v1787_v61  ;;  %1744 = vmatprep.subr.bf16.mxu1 %v1743_v2  ;;  %v460_v61 = vld [vmem:[#allocation7 + $0x370] sm:$0xff]  ;;  %v465_v2 = vld [vmem:[#allocation7 + $0x398] sm:$0xff]  ;;  %v1771_v26 = vpack.c.bf16 %v486_v20, %v481_v19  ;;  %v443_v28 = vld [vmem:[#allocation7 + $0x2e8] sm:$0xff] }
  0xdd   : > { %939 = vmatprep.mubr.f32.mxu0 %v2598_v39  ;;  %v437_v25 = vld [vmem:[#allocation7 + $0x2b8] sm:$0xff]  ;;  %v448_v29 = vld [vmem:[#allocation7 + $0x310] sm:$0xff]  ;;  %v491_v30 = vld [vmem:[#allocation7 + $0x468] sm:$0xff] }
  0xde   : > { %v496_v31 = vld [vmem:[#allocation7 + $0x490] sm:$0xff]  ;;  %v1817_v32 = vpack.c.bf16 %v437_v25, %v432_v24  ;;  %v1819_v34 = vpack.c.bf16 %v448_v29, %v443_v28  ;;  %v447_v37 = vld [vmem:[#allocation7 + $0x308] sm:$0xff]  ;;  %v453_v41 = vld [vmem:[#allocation7 + $0x338] sm:$0xff] }
  0xdf   : > { %1790 = vmatpush1.bf16.msra.mxu0 %v1789_v10  ;;  %1746 = vmatpush1.bf16.msra.mxu1 %v1745_v11  ;;  %v1765_v10 = vpack.c.bf16 %v465_v2, %v460_v61  ;;  %v1811_v11 = vpack.c.bf16 %v428_v4, %v423_v3  ;;  %v1775_v38 = vpack.c.bf16 %v496_v31, %v491_v30  ;;  %v458_v42 = vld [vmem:[#allocation7 + $0x360] sm:$0xff]  ;;  %v501_v43 = vld [vmem:[#allocation7 + $0x4b8] sm:$0xff]  ;;  %v452_v49 = vld [vmem:[#allocation7 + $0x330] sm:$0xff] }
  0xe0   : > { %1792 = vmatprep.subr.bf16.mxu0 %v1791_v12  ;;  %1748 = vmatprep.subr.bf16.mxu1 %v1747_v16  ;;  %v470_v12 = vld [vmem:[#allocation7 + $0x3c0] sm:$0xff]  ;;  %v475_v16 = vld [vmem:[#allocation7 + $0x3e8] sm:$0xff]  ;;  %v457_v50 = vld [vmem:[#allocation7 + $0x358] sm:$0xff] }
  0xe1   : > { %v506_v44 = vld [vmem:[#allocation7 + $0x4e0] sm:$0xff]  ;;  %v463_v53 = vld [vmem:[#allocation7 + $0x388] sm:$0xff]  ;;  %v468_v54 = vld [vmem:[#allocation7 + $0x3b0] sm:$0xff]  ;;  %v1825_v57 = vpack.c.bf16 %v457_v50, %v452_v49 }
  0xe2   : > { %v1779_v51 = vpack.c.bf16 %v506_v44, %v501_v43  ;;  %v434_v55 = vld [vmem:[#allocation7 + $0x2a0] sm:$0xff]  ;;  %v439_v56 = vld [vmem:[#allocation7 + $0x2c8] sm:$0xff]  ;;  %v473_v2 = vld [vmem:[#allocation7 + $0x3d8] sm:$0xff] }
  0xe3   : > { %1794 = vmatpush1.bf16.msra.mxu0 %v1793_v7  ;;  %1750 = vmatpush1.bf16.msra.mxu1 %v1749_v22  ;;  %v1769_v7 = vpack.c.bf16 %v475_v16, %v470_v12  ;;  %v1815_v22 = vpack.c.bf16 %v438_v18, %v433_v17  ;;  %v467_v61 = vld [vmem:[#allocation7 + $0x3a8] sm:$0xff]  ;;  %v354_v62 = vld [vmem:[#allocation7 + $0x20] sm:$0xff]  ;;  %v1847_v63 = vpack.c.bf16 %v439_v56, %v434_v55  ;;  %v444_v4 = vld [vmem:[#allocation7 + $0x2f0] sm:$0xff] }
  0xe4   : > { %1796 = vmatprep.subr.bf16.mxu0 %v1795_v23  ;;  %1752 = vmatprep.subr.bf16.mxu1 %v1751_v27  ;;  %v480_v23 = vld [vmem:[#allocation7 + $0x410] sm:$0xff]  ;;  %v485_v27 = vld [vmem:[#allocation7 + $0x438] sm:$0xff]  ;;  %v478_v3 = vld [vmem:[#allocation7 + $0x400] sm:$0xff] }
  0xe5   : > { %v449_v5 = vld [vmem:[#allocation7 + $0x318] sm:$0xff]  ;;  %v2603_v6 = vld [vmem:[%s2555_s26] sm:$0xff]  ;;  %v483_v17 = vld [vmem:[#allocation7 + $0x428] sm:$0xff]  ;;  %s2206_s26 = scalar_lea.vmem %s2205_s16, 256 }
  0xe6   : > { %v472_v12 = vld [vmem:[#allocation7 + $0x3d0] sm:$0xff]  ;;  %v477_v13 = vld [vmem:[#allocation7 + $0x3f8] sm:$0xff]  ;;  %v454_v19 = vld [vmem:[#allocation7 + $0x340] sm:$0xff]  ;;  %p2208_p8 = scmp.lt.s32.totalorder %s2206_s26, %s2200_s19 }
  0xe7   : > { %1798 = vmatpush1.bf16.msra.mxu0 %v1797_v33  ;;  %1754 = vmatpush1.bf16.msra.mxu1 %v1753_v35  ;;  %v1773_v33 = vpack.c.bf16 %v485_v27, %v480_v23  ;;  %v490_v35 = vld [vmem:[#allocation7 + $0x460] sm:$0xff]  ;;  %v364_v14 = vld [vmem:[#allocation7 + $0x70] sm:$0xff]  ;;  %v369_v16 = vld [vmem:[#allocation7 + $0x98] sm:$0xff] }
  0xe8   : > { %1800 = vmatprep.subr.bf16.mxu0 %v1799_v36  ;;  %1756 = vmatprep.subr.bf16.mxu1 %v1755_v40  ;;  %v442_v36 = vld [vmem:[#allocation7 + $0x2e0] sm:$0xff]  ;;  %v495_v40 = vld [vmem:[#allocation7 + $0x488] sm:$0xff]  ;;  %v488_v18 = vld [vmem:[#allocation7 + $0x450] sm:$0xff]  ;;  %p2209_p6 = por %p2208_p8, %p2207_p0 }
  0xe9   : > { %v1821_v45 = vpack.c.bf16 %v447_v37, %v442_v36  ;;  %v459_v20 = vld [vmem:[#allocation7 + $0x368] sm:$0xff]  ;;  %v482_v23 = vld [vmem:[#allocation7 + $0x420] sm:$0xff]  ;;  %v493_v28 = vld [vmem:[#allocation7 + $0x478] sm:$0xff] }
  0xea   : > { %v487_v24 = vld [vmem:[#allocation7 + $0x448] sm:$0xff]  ;;  %v374_v25 = vld [vmem:[#allocation7 + $0xc0] sm:$0xff]  ;;  %v464_v30 = vld [vmem:[#allocation7 + $0x390] sm:$0xff]  ;;  %p2210_p10 = pnand %p2209_p6, %p2203_p4 }
  0xeb   : > { %1802 = vmatpush1.bf16.msra.mxu0 %v1801_v46  ;;  %1758 = vmatpush1.bf16.msra.mxu1 %v1757_v47  ;;  %v1777_v46 = vpack.c.bf16 %v495_v40, %v490_v35  ;;  %v1823_v47 = vpack.c.bf16 %v458_v42, %v453_v41  ;;  %v379_v27 = vld [vmem:[#allocation7 + $0xe8] sm:$0xff]  ;;  %v498_v29 = vld [vmem:[#allocation7 + $0x4a0] sm:$0xff]  ;;  %v469_v31 = vld [vmem:[#allocation7 + $0x3b8] sm:$0xff] }
  0xec   : > { %1804 = vmatprep.subr.bf16.mxu0 %v1803_v48  ;;  %1760 = vmatprep.subr.bf16.mxu1 %v1759_v52  ;;  %v500_v48 = vld [vmem:[#allocation7 + $0x4b0] sm:$0xff]  ;;  %v505_v52 = vld [vmem:[#allocation7 + $0x4d8] sm:$0xff]  ;;  %v503_v41 = vld [vmem:[#allocation7 + $0x4c8] sm:$0xff] }
  0xed   : > { %v492_v35 = vld [vmem:[#allocation7 + $0x470] sm:$0xff]  ;;  %v497_v36 = vld [vmem:[#allocation7 + $0x498] sm:$0xff]  ;;  %v474_v43 = vld [vmem:[#allocation7 + $0x3e0] sm:$0xff] }
  0xee   : > { %v384_v37 = vld [vmem:[#allocation7 + $0x110] sm:$0xff]  ;;  %v389_v40 = vld [vmem:[#allocation7 + $0x138] sm:$0xff]  ;;  %v479_v44 = vld [vmem:[#allocation7 + $0x408] sm:$0xff] }
  0xef   : > { %1806 = vmatpush1.bf16.msra.mxu0 %v1805_v58  ;;  %1762 = vmatpush1.bf16.msra.mxu1 %v1761_v59  ;;  %v1781_v58 = vpack.c.bf16 %v505_v52, %v500_v48  ;;  %v1827_v59 = vpack.c.bf16 %v468_v54, %v463_v53  ;;  %v508_v42 = vld [vmem:[#allocation7 + $0x4f0] sm:$0xff]  ;;  %v507_v48 = vld [vmem:[#allocation7 + $0x4e8] sm:$0xff]  ;;  %v1863_v49 = vpack.c.bf16 %v479_v44, %v474_v43  ;;  %v394_v50 = vld [vmem:[#allocation7 + $0x160] sm:$0xff] }
  0xf0   : > { %1808 = vmatprep.subr.bf16.mxu0 %v1807_v60  ;;  %1764 = vmatprep.subr.bf16.mxu1 %v1763_v1  ;;  %v462_v60 = vld [vmem:[#allocation7 + $0x380] sm:$0xff]  ;;  %v359_v1 = vld [vmem:[#allocation7 + $0x48] sm:$0xff]  ;;  %v484_v52 = vld [vmem:[#allocation7 + $0x430] sm:$0xff] }
  0xf1   : > { %v489_v53 = vld [vmem:[#allocation7 + $0x458] sm:$0xff]  ;;  %v1072_v43 = vld [vmem:[#allocation10 + $0x198] sm:$0xff] }
  0xf2   : > { %v1867_v56 = vpack.c.bf16 %v489_v53, %v484_v52  ;;  %v1031_v52 = vld [vmem:[#allocation10 + $0x50] sm:$0xff]  ;;  %v1032_v53 = vld [vmem:[#allocation10 + $0x58] sm:$0xff] }
  0xf3   : > { %1810 = vmatpush1.bf16.msra.mxu0 %v1809_v8  ;;  %1766 = vmatpush1.bf16.msra.mxu1 %v1765_v10  ;;  %v1829_v8 = vpack.c.bf16 %v467_v61, %v462_v60  ;;  %v1849_v10 = vpack.c.bf16 %v359_v1, %v354_v62  ;;  %v499_v60 = vld [vmem:[#allocation7 + $0x4a8] sm:$0xff] }
  0xf4   : > { %1812 = vmatprep.subr.bf16.mxu0 %v1811_v11  ;;  %1768 = vmatprep.subr.bf16.mxu1 %v1767_v15  ;;  %v1831_v11 = vpack.c.bf16 %v478_v3, %v473_v2  ;;  %v1851_v15 = vpack.c.bf16 %v449_v5, %v444_v4  ;;  %v419_v1 = vld [vmem:[#allocation7 + $0x228] sm:$0xff]  ;;  %v504_v2 = vld [vmem:[#allocation7 + $0x4d0] sm:$0xff]  ;;  %v509_v3 = vld [vmem:[#allocation7 + $0x4f8] sm:$0xff] }
  0xf5   : > { %v1875_v5 = vpack.c.bf16 %v509_v3, %v504_v2  ;;  %v1052_v2 = vld [vmem:[#allocation10 + $0xf8] sm:$0xff]  ;;  %v1073_v3 = vld [vmem:[#allocation10 + $0x1a0] sm:$0xff] }
  0xf7   : > { %1814 = vmatpush1.bf16.msra.mxu0 %v1813_v21  ;;  %1770 = vmatpush1.bf16.msra.mxu1 %v1769_v7  ;;  %v1833_v21 = vpack.c.bf16 %v477_v13, %v472_v12  ;;  %v1853_v7 = vpack.c.bf16 %v369_v16, %v364_v14  ;;  %v1037_v12 = vld [vmem:[#allocation10 + $0x80] sm:$0xff]  ;;  %v1038_v13 = vld [vmem:[#allocation10 + $0x88] sm:$0xff] }
  0xf8   : > { %1816 = vmatprep.subr.bf16.mxu0 %v1815_v22  ;;  %1772 = vmatprep.subr.bf16.mxu1 %v1771_v26  ;;  %v1835_v22 = vpack.c.bf16 %v488_v18, %v483_v17  ;;  %v1855_v26 = vpack.c.bf16 %v459_v20, %v454_v19  ;;  %v1021_v14 = vld [vmem:[#allocation10] sm:$0xff]  ;;  %v1022_v16 = vld [vmem:[#allocation10 + $0x8] sm:$0xff]  ;;  %v1039_v17 = vld [vmem:[#allocation10 + $0x90] sm:$0xff] }
  0xf9   : > { %v1040_v18 = vld [vmem:[#allocation10 + $0x98] sm:$0xff]  ;;  %v1881_v19 = vpack.c.bf16 %v1022_v16, %v1021_v14  ;;  %v1058_v14 = vld [vmem:[#allocation10 + $0x128] sm:$0xff]  ;;  %v1075_v16 = vld [vmem:[#allocation10 + $0x1b0] sm:$0xff] }
  0xfa   : > { %v1883_v20 = vpack.c.bf16 %v1040_v18, %v1039_v17  ;;  %v1076_v17 = vld [vmem:[#allocation10 + $0x1b8] sm:$0xff] }
  0xfb   : > { %1818 = vmatpush1.bf16.msra.mxu0 %v1817_v32  ;;  %1774 = vmatpush1.bf16.msra.mxu1 %v1773_v33  ;;  %v1837_v32 = vpack.c.bf16 %v487_v24, %v482_v23  ;;  %v1857_v33 = vpack.c.bf16 %v379_v27, %v374_v25  ;;  %v1042_v23 = vld [vmem:[#allocation10 + $0xa8] sm:$0xff]  ;;  %v1043_v27 = vld [vmem:[#allocation10 + $0xb0] sm:$0xff]  ;;  %v1923_v18 = vpack.c.bf16 %v1076_v17, %v1075_v16 }
  0xfc   : > { %1820 = vmatprep.subr.bf16.mxu0 %v1819_v34  ;;  %1776 = vmatprep.subr.bf16.mxu1 %v1775_v38  ;;  %v1839_v34 = vpack.c.bf16 %v498_v29, %v493_v28  ;;  %v1859_v38 = vpack.c.bf16 %v469_v31, %v464_v30  ;;  %v1044_v28 = vld [vmem:[#allocation10 + $0xb8] sm:$0xff]  ;;  %v1069_v29 = vld [vmem:[#allocation10 + $0x180] sm:$0xff]  ;;  %v1070_v30 = vld [vmem:[#allocation10 + $0x188] sm:$0xff] }
  0xff   : > { %1822 = vmatpush1.bf16.msra.mxu0 %v1821_v45  ;;  %1778 = vmatpush1.bf16.msra.mxu1 %v1777_v46  ;;  %v1861_v45 = vpack.c.bf16 %v389_v40, %v384_v37  ;;  %v1843_v46 = vpack.c.bf16 %v508_v42, %v503_v41  ;;  %v1045_v37 = vld [vmem:[#allocation10 + $0xc0] sm:$0xff]  ;;  %v1046_v40 = vld [vmem:[#allocation10 + $0xc8] sm:$0xff]  ;;  %v1071_v42 = vld [vmem:[#allocation10 + $0x190] sm:$0xff] }
 0x100   : > { %1824 = vmatprep.subr.bf16.mxu0 %v1823_v47  ;;  %1780 = vmatprep.subr.bf16.mxu1 %v1779_v51  ;;  %v502_v47 = vld [vmem:[#allocation7 + $0x4c0] sm:$0xff]  ;;  %v399_v51 = vld [vmem:[#allocation7 + $0x188] sm:$0xff]  ;;  %v1915_v44 = vpack.c.bf16 %v1072_v43, %v1071_v42 }
 0x101   : > { %v1845_v54 = vpack.c.bf16 %v507_v48, %v502_v47  ;;  %v1865_v55 = vpack.c.bf16 %v399_v51, %v394_v50  ;;  %v1030_v47 = vld [vmem:[#allocation10 + $0x48] sm:$0xff]  ;;  %v1047_v48 = vld [vmem:[#allocation10 + $0xd0] sm:$0xff]  ;;  %v1068_v43 = vld [vmem:[#allocation10 + $0x178] sm:$0xff] }
 0x102   : > { %v1067_v42 = vld [vmem:[#allocation10 + $0x170] sm:$0xff] }
 0x103   : > { %1826 = vmatpush1.bf16.msra.mxu0 %v1825_v57  ;;  %1782 = vmatpush1.bf16.msra.mxu1 %v1781_v58  ;;  %v404_v57 = vld [vmem:[#allocation7 + $0x1b0] sm:$0xff]  ;;  %v409_v58 = vld [vmem:[#allocation7 + $0x1d8] sm:$0xff] }
 0x104   : > { %1828 = vmatprep.subr.bf16.mxu0 %v1827_v59  ;;  %1848 = vmatprep.subr.bf16.mxu1 %v1847_v63  ;;  %v494_v59 = vld [vmem:[#allocation7 + $0x480] sm:$0xff]  ;;  %v1869_v61 = vpack.c.bf16 %v409_v58, %v404_v57  ;;  %v1033_v58 = vld [vmem:[#allocation10 + $0x60] sm:$0xff] }
 0x105   : > { %v1871_v62 = vpack.c.bf16 %v499_v60, %v494_v59  ;;  %v414_v63 = vld [vmem:[#allocation7 + $0x200] sm:$0xff]  ;;  %v1034_v59 = vld [vmem:[#allocation10 + $0x68] sm:$0xff] }
 0x106   : > { %869 = vmatmul.mubr.f32.vlgmr.msra.gmra.mrb[2].mxu1 %v2603_v6  ;;  %v1873_v4 = vpack.c.bf16 %v419_v1, %v414_v63  ;;  %v1055_v60 = vld [vmem:[#allocation10 + $0x110] sm:$0xff] }
 0x107   : > { %1830 = vmatpush1.bf16.msra.mxu0 %v1829_v8  ;;  %1850 = vmatpush3.bf16.msra.mxu1 %v1849_v10  ;;  %v424_v8 = vld [vmem:[#allocation7 + $0x250] sm:$0xff]  ;;  %v429_v10 = vld [vmem:[#allocation7 + $0x278] sm:$0xff]  ;;  %v1051_v1 = vld [vmem:[#allocation10 + $0xf0] sm:$0xff] }
 0x108   : > { %1832 = vmatprep.subr.bf16.mxu0 %v1831_v11  ;;  %1852 = vmatprep.subr.bf16.mxu1 %v1851_v15  ;;  %v1877_v11 = vpack.c.bf16 %v429_v10, %v424_v8  ;;  %v1879_v15 = vpack.c.bf16 %v1038_v13, %v1037_v12  ;;  %v1035_v8 = vld [vmem:[#allocation10 + $0x70] sm:$0xff]  ;;  %v1036_v10 = vld [vmem:[#allocation10 + $0x78] sm:$0xff]  ;;  %v1057_v13 = vld [vmem:[#allocation10 + $0x120] sm:$0xff] }
 0x109   : > { %1010 = vmatprep.mubr.f32.mxu1 %v2598_v39  ;;  %v1841_v39 = vpack.c.bf16 %v497_v36, %v492_v35  ;;  %v1891_v35 = vpack.c.bf16 %v1044_v28, %v1043_v27  ;;  %v1028_v36 = vld [vmem:[#allocation10 + $0x38] sm:$0xff]  ;;  %v1909_v12 = vpack.c.bf16 %v1036_v10, %v1035_v8  ;;  %v1063_v28 = vld [vmem:[#allocation10 + $0x150] sm:$0xff]  ;;  %v1089_v8 = vld [vmem:[#allocation10 + $0x220] sm:$0xff] }
 0x10a   : > { %v1080_v27 = vld [vmem:[#allocation10 + $0x1d8] sm:$0xff]  ;;  %v1090_v10 = vld [vmem:[#allocation10 + $0x228] sm:$0xff] }
 0x10b   : > { %1834 = vmatpush1.bf16.msra.mxu0 %v1833_v21  ;;  %1854 = vmatpush3.bf16.msra.mxu1 %v1853_v7  ;;  %v1023_v21 = vld [vmem:[#allocation10 + $0x10] sm:$0xff]  ;;  %v1024_v7 = vld [vmem:[#allocation10 + $0x18] sm:$0xff] }
 0x10c   : > { %1836 = vmatprep.subr.bf16.mxu0 %v1835_v22  ;;  %1856 = vmatprep.subr.bf16.mxu1 %v1855_v26  ;;  %v1041_v22 = vld [vmem:[#allocation10 + $0xa0] sm:$0xff]  ;;  %v1885_v24 = vpack.c.bf16 %v1024_v7, %v1023_v21 }
 0x10d   : > { %v1887_v25 = vpack.c.bf16 %v1042_v23, %v1041_v22  ;;  %v1025_v26 = vld [vmem:[#allocation10 + $0x20] sm:$0xff]  ;;  %v1078_v22 = vld [vmem:[#allocation10 + $0x1c8] sm:$0xff] }
 0x10e   : > { %v1077_v7 = vld [vmem:[#allocation10 + $0x1c0] sm:$0xff] }
 0x10f   : > { %1838 = vmatpush1.bf16.msra.mxu0 %v1837_v32  ;;  %1858 = vmatpush3.bf16.msra.mxu1 %v1857_v33  ;;  %v1027_v32 = vld [vmem:[#allocation10 + $0x30] sm:$0xff]  ;;  %v1911_v33 = vpack.c.bf16 %v1070_v30, %v1069_v29  ;;  %v1061_v23 = vld [vmem:[#allocation10 + $0x140] sm:$0xff]  ;;  %v1064_v30 = vld [vmem:[#allocation10 + $0x158] sm:$0xff] }
 0x110   : > { %1840 = vmatprep.subr.bf16.mxu0 %v1839_v34  ;;  %1860 = vmatprep.subr.bf16.mxu1 %v1859_v38  ;;  %v1053_v34 = vld [vmem:[#allocation10 + $0x100] sm:$0xff]  ;;  %v1054_v38 = vld [vmem:[#allocation10 + $0x108] sm:$0xff] }
 0x111   : > { %v1913_v41 = vpack.c.bf16 %v1054_v38, %v1053_v34  ;;  %v1083_v38 = vld [vmem:[#allocation10 + $0x1f0] sm:$0xff] }
 0x113   : > { %1842 = vmatpush1.bf16.msra.mxu0 %v1841_v39  ;;  %1862 = vmatpush3.bf16.msra.mxu1 %v1861_v45  ;;  %v1893_v39 = vpack.c.bf16 %v1028_v36, %v1027_v32  ;;  %v1895_v45 = vpack.c.bf16 %v1046_v40, %v1045_v37  ;;  %v1081_v32 = vld [vmem:[#allocation10 + $0x1e0] sm:$0xff]  ;;  %v1066_v36 = vld [vmem:[#allocation10 + $0x168] sm:$0xff]  ;;  %v1084_v40 = vld [vmem:[#allocation10 + $0x1f8] sm:$0xff] }
 0x114   : > { %1844 = vmatprep.subr.bf16.mxu0 %v1843_v46  ;;  %1864 = vmatprep.subr.bf16.mxu1 %v1863_v49  ;;  %v1029_v46 = vld [vmem:[#allocation10 + $0x40] sm:$0xff]  ;;  %v1048_v49 = vld [vmem:[#allocation10 + $0xd8] sm:$0xff] }
 0x115   : > { %v1897_v50 = vpack.c.bf16 %v1030_v47, %v1029_v46  ;;  %v1899_v51 = vpack.c.bf16 %v1048_v49, %v1047_v48 }
 0x117   : > { %1846 = vmatpush1.bf16.msra.mxu0 %v1845_v54  ;;  %1866 = vmatpush3.bf16.msra.mxu1 %v1865_v55  ;;  %v1049_v54 = vld [vmem:[#allocation10 + $0xe0] sm:$0xff]  ;;  %v1050_v55 = vld [vmem:[#allocation10 + $0xe8] sm:$0xff] }
 0x118   : > { %1868 = vmatprep.subr.bf16.mxu1 %v1867_v56  ;;  %1880 = vmatprep.subr.bf16.mxu0 %v1879_v15  ;;  %v1901_v56 = vpack.c.bf16 %v1032_v53, %v1031_v52  ;;  %v1903_v57 = vpack.c.bf16 %v1050_v55, %v1049_v54  ;;  %v1921_v15 = vpack.c.bf16 %v1058_v14, %v1057_v13  ;;  %v777_v53 = vld [vmem:[%s2687_s5] sm:$0x1f]  ;;  %v1091_v14 = vld [vmem:[#allocation10 + $0x230] sm:$0xff] }
 0x11a   : > { %940 = vmatmul.mubr.f32.vlgmr.msra.gmra.mrb[4].mxu0 %v2603_v6 }
 0x11b   : > { %1870 = vmatpush3.bf16.msra.mxu1 %v1869_v61  ;;  %1882 = vmatpush3.bf16.msra.mxu0 %v1881_v19  ;;  %v1905_v61 = vpack.c.bf16 %v1034_v59, %v1033_v58  ;;  %v1059_v19 = vld [vmem:[#allocation10 + $0x130] sm:$0xff] }
 0x11c   : > { %1872 = vmatprep.subr.bf16.mxu1 %v1871_v62  ;;  %1884 = vmatprep.subr.bf16.mxu0 %v1883_v20  ;;  %v1056_v62 = vld [vmem:[#allocation10 + $0x118] sm:$0xff] }
 0x11d   : > { %v1917_v63 = vpack.c.bf16 %v1056_v62, %v1055_v60  ;;  %v1060_v20 = vld [vmem:[#allocation10 + $0x138] sm:$0xff]  ;;  %v1085_v60 = vld [vmem:[#allocation10 + $0x200] sm:$0xff] }
 0x11e   : > { %v1925_v21 = vpack.c.bf16 %v1060_v20, %v1059_v19  ;;  %v1094_v19 = vld [vmem:[#allocation10 + $0x248] sm:$0xff] }
 0x11f   : > { %1874 = vmatpush3.bf16.msra.mxu1 %v1873_v4  ;;  %1886 = vmatpush3.bf16.msra.mxu0 %v1885_v24  ;;  %v1907_v4 = vpack.c.bf16 %v1052_v2, %v1051_v1  ;;  %v1927_v24 = vpack.c.bf16 %v1078_v22, %v1077_v7 }
 0x120   : > { %1876 = vmatprep.subr.bf16.mxu1 %v1875_v5  ;;  %1888 = vmatprep.subr.bf16.mxu0 %v1887_v25  ;;  %v1074_v5 = vld [vmem:[#allocation10 + $0x1a8] sm:$0xff] }
 0x121   : > { %v1062_v25 = vld [vmem:[#allocation10 + $0x148] sm:$0xff] }
 0x123   : > { %1878 = vmatpush3.bf16.msra.mxu1 %v1877_v11  ;;  %v1919_v11 = vpack.c.bf16 %v1074_v5, %v1073_v3  ;;  %v1087_v3 = vld [vmem:[#allocation10 + $0x210] sm:$0xff] }
 0x124   : > { %1912 = vmatprep.subr.bf16.mxu1 %v1911_v33  ;;  %v1082_v33 = vld [vmem:[#allocation10 + $0x1e8] sm:$0xff] }
 0x125   : > { %v1935_v34 = vpack.c.bf16 %v1082_v33, %v1081_v32  ;;  %v1099_v32 = vld [vmem:[#allocation10 + $0x270] sm:$0xff]  ;;  %v1100_v33 = vld [vmem:[#allocation10 + $0x278] sm:$0xff] }
 0x126   : > { %1011 = vmatmul.mubr.f32.vlgmr.msra.gmra.mrb[4].mxu1 %v2603_v6  ;;  %v1026_v6 = vld [vmem:[#allocation10 + $0x28] sm:$0xff] }
 0x127   : > { %v1889_v31 = vpack.c.bf16 %v1026_v6, %v1025_v26  ;;  %1914 = vmatpush3.bf16.msra.mxu1 %v1913_v41  ;;  %v1929_v26 = vpack.c.bf16 %v1062_v25, %v1061_v23  ;;  %v1079_v6 = vld [vmem:[#allocation10 + $0x1d0] sm:$0xff]  ;;  %v1939_v41 = vpack.c.bf16 %v1084_v40, %v1083_v38  ;;  %v1096_v25 = vld [vmem:[#allocation10 + $0x258] sm:$0xff] }
 0x128   : > { %1916 = vmatprep.subr.bf16.mxu1 %v1915_v44  ;;  %v1931_v29 = vpack.c.bf16 %v1080_v27, %v1079_v6  ;;  %v1941_v44 = vpack.c.bf16 %v1068_v43, %v1067_v42 }
 0x129   : > { %1890 = vmatpush3.bf16.msra.mxu0 %v1889_v31  ;;  %v1933_v31 = vpack.c.bf16 %v1064_v30, %v1063_v28  ;;  %v1097_v28 = vld [vmem:[#allocation10 + $0x260] sm:$0xff] }
 0x12a   : > { %1892 = vmatprep.subr.bf16.mxu0 %v1891_v35  ;;  %v1065_v35 = vld [vmem:[#allocation10 + $0x160] sm:$0xff] }
 0x12b   : > { %1918 = vmatpush3.bf16.msra.mxu1 %v1917_v63  ;;  %v1937_v37 = vpack.c.bf16 %v1066_v36, %v1065_v35  ;;  %v1965_v36 = vpack.c.bf16 %v1100_v33, %v1099_v32 }
 0x12c   : > { %1920 = vmatprep.subr.bf16.mxu1 %v1919_v11  ;;  %v1950_v11 = vpack.c.bf16 %v1090_v10, %v1089_v8 }
 0x12d   : > { %1894 = vmatpush3.bf16.msra.mxu0 %v1893_v39 }
 0x12e   : > { %1896 = vmatprep.subr.bf16.mxu0 %v1895_v45 }
 0x12f   : > { %1922 = vmatpush3.bf16.msra.mxu1 %v1921_v15  ;;  %v1092_v15 = vld [vmem:[#allocation10 + $0x238] sm:$0xff] }
 0x130   : > { %1924 = vmatprep.subr.bf16.mxu1 %v1923_v18  ;;  %v1953_v17 = vpack.c.bf16 %v1092_v15, %v1091_v14  ;;  %v1093_v18 = vld [vmem:[#allocation10 + $0x240] sm:$0xff] }
 0x131   : > { %1898 = vmatpush3.bf16.msra.mxu0 %v1897_v50  ;;  %v779_v50 = vlaneseq  ;;  %v1956_v22 = vpack.c.bf16 %v1094_v19, %v1093_v18 }
 0x132   : > { %1900 = vmatprep.subr.bf16.mxu0 %v1899_v51 }
 0x133   : > { %1926 = vmatpush3.bf16.msra.mxu1 %v1925_v21  ;;  %v2612_v51 = vshrl.u32 %v779_v50, 7 }
 0x134   : > { %1928 = vmatprep.subr.bf16.mxu1 %v1927_v24  ;;  %v1095_v24 = vld [vmem:[#allocation10 + $0x250] sm:$0xff] }
 0x135   : > { %1902 = vmatpush3.bf16.msra.mxu0 %v1901_v56  ;;  %v781_v52 = vsub.s32 0, %v2612_v51  ;;  %v785_v54 = vsub.s32 1, %v2612_v51  ;;  %v793_v13 = vsub.s32 3, %v2612_v51  ;;  %v1959_v27 = vpack.c.bf16 %v1096_v25, %v1095_v24 }
 0x136   : > { %1904 = vmatprep.subr.bf16.mxu0 %v1903_v57  ;;  %v797_v30 = vsub.s32 4, %v2612_v51 }
 0x137   : > { %1930 = vmatpush3.bf16.msra.mxu1 %v1929_v26  ;;  %v782_v55 = vrot.slane %v777_v53, %v781_v52  ;;  %v786_v56 = vrot.slane %v777_v53, %v785_v54 }
 0x138   : > { %1932 = vmatprep.subr.bf16.mxu1 %v1931_v29  ;;  %v1098_v29 = vld [vmem:[#allocation10 + $0x268] sm:$0xff]  ;;  %v798_v35 = vrot.slane %v777_v53, %v797_v30 }
 0x139   : > { %1906 = vmatpush3.bf16.msra.mxu0 %v1905_v61  ;;  %v1086_v61 = vld [vmem:[#allocation10 + $0x208] sm:$0xff] }
 0x13a   : > { %1908 = vmatprep.subr.bf16.mxu0 %v1907_v4  ;;  %v1944_v2 = vpack.c.bf16 %v1086_v61, %v1085_v60  ;;  %v1088_v4 = vld [vmem:[#allocation10 + $0x218] sm:$0xff] }
 0x13b   : > { %1934 = vmatpush3.bf16.msra.mxu1 %v1933_v31  ;;  %v1947_v5 = vpack.c.bf16 %v1088_v4, %v1087_v3  ;;  %v1962_v31 = vpack.c.bf16 %v1098_v29, %v1097_v28 }
 0x13c   : > { %1936 = vmatprep.subr.bf16.mxu1 %v1935_v34 }
 0x13d   : > { %1910 = vmatpush3.bf16.msra.mxu0 %v1909_v12  ;;  %v789_v12 = vsub.s32 2, %v2612_v51 }
 0x13e   : > { %1943 = vmatprep.subr.bf16.mxu0 %v2290_v9 }
 0x13f   : > { %1938 = vmatpush3.bf16.msra.mxu1 %v1937_v37  ;;  %v790_v16 = vrot.slane %v777_v53, %v789_v12 }
 0x140   : > { %1940 = vmatprep.subr.bf16.mxu1 %v1939_v41 }
 0x143   : > { %1942 = vmatpush3.bf16.msra.mxu1 %v1941_v44 }
 0x199   : > { %v631_v39 = vpop.f32.mrb[0].mxu0  ;;  %v702_v45 = vpop.f32.mrb[0].mxu1 }
 0x19a   : > { %v633_v46 = vpop.f32.mrb[1].mxu0  ;;  %v704_v47 = vpop.f32.mrb[1].mxu1 }
 0x1ad   : > { %v2610_v48 = vpop.f32.mrb[2].mxu0 }
 0x1ae   : > { %v1628_v49 = vpop.f32.mrb[3].mxu0 }
 0x1d9   : > { %v870_v57 = vpop.f32.mrb[2].mxu1 }
 0x1da   : > { %v871_v58 = vadd.f32 %v870_v57, %v782_v55  ;;  %v872_v59 = vpop.f32.mrb[3].mxu1 }
 0x1db   : > { %v873_v62 = vadd.f32 %v872_v59, %v786_v56 }
 0x1dc   : > { %v1016_v63 = vmul.f32 %v871_v58, %v631_v39 }
 0x1dd   : > { %v1017_v1 = vmul.f32 %v873_v62, %v633_v46 }
 0x1df   : > { %1165 = vmatprep.mubr.f32.mxu0 %v1017_v1 }
 0x1e0   : > { %1166 = vmatmul.mubr.f32.vlgmr.msra.gmra.mrb[6].mxu0 %v1016_v63 }
 0x1e1   : > { %1945 = vmatpush3.bf16.msra.mxu0 %v1944_v2  ;;  %1661 = vmatprep.mubr.msk.f32.mxu0 %vm2291_vm1, %v2289_v0  ;;  %v794_v0 = vrot.slane %v777_v53, %v793_v13 }
 0x1e2   : > { %1946 = vmatprep.subr.bf16.mxu0 %v2290_v9 }
 0x1e5   : > { %1948 = vmatpush3.bf16.msra.mxu0 %v1947_v5 }
 0x1e6   : > { %1949 = vmatprep.subr.bf16.mxu0 %v2290_v9 }
 0x1e9   : > { %1951 = vmatpush3.bf16.msra.mxu0 %v1950_v11 }
 0x1ea   : > { %1952 = vmatprep.subr.bf16.mxu0 %v2290_v9 }
 0x1ed   : > { %v941_v20 = vpop.f32.mrb[4].mxu0  ;;  %1954 = vmatpush3.bf16.msra.mxu0 %v1953_v17 }
 0x1ee   : > { %v942_v21 = vadd.f32 %v941_v20, %v790_v16  ;;  %v943_v7 = vpop.f32.mrb[5].mxu0  ;;  %1955 = vmatprep.subr.bf16.mxu0 %v2290_v9 }
 0x1ef   : > { %v944_v23 = vadd.f32 %v943_v7, %v794_v0 }
 0x1f0   : > { %v1018_v26 = vmul.f32 %v942_v21, %v702_v45 }
 0x1f1   : > { %v1019_v6 = vmul.f32 %v944_v23, %v704_v47  ;;  %1957 = vmatpush3.bf16.msra.mxu0 %v1956_v22 }
 0x1f2   : > { %1958 = vmatprep.subr.bf16.mxu0 %v2290_v9 }
 0x1f3   : > { %1235 = vmatprep.mubr.f32.mxu1 %v1019_v6 }
 0x1f4   : > { %1236 = vmatmul.mubr.f32.vlgmr.msra.gmra.mrb[6].mxu1 %v1018_v26 }
 0x1f5   : > { %1960 = vmatpush3.bf16.msra.mxu0 %v1959_v27 }
 0x1f6   : > { %1961 = vmatprep.subr.bf16.mxu0 %v2290_v9 }
 0x1f9   : > { %v1516_v34 = vpop.f32.mrb[4].mxu1  ;;  %1963 = vmatpush3.bf16.msra.mxu0 %v1962_v31 }
 0x1fa   : > { %v1517_v37 = vpop.f32.mrb[5].mxu1  ;;  %1964 = vmatprep.subr.bf16.mxu0 %v2290_v9 }
 0x1fb   : > { %v1518_v38 = vadd.f32 %v1517_v37, %v1516_v34 }
 0x1fd   : > { %v1013_v40 = vadd.f32 %v1518_v38, %v798_v35  ;;  %1966 = vmatpush3.bf16.msra.mxu0 %v1965_v36 }
 0x1ff   : > { %v1020_v41 = vmul.f32 %v1013_v40, %v2610_v48 }
 0x201   : > { %1662 = vmatmul.mubr.f32.vlgmr.msra.gmra.mrb[8].mxu0 %v1020_v41 }
 0x2b3   : > { %v1551_v42 = vpop.f32.mrb[6].mxu0 }
 0x2b4   : > { %v1552_v43 = vpop.f32.mrb[7].mxu0 }
 0x2b5   : > { %v1553_v44 = vadd.f32 %v1552_v43, %v1551_v42 }
 0x2c7   : > { %v1586_v39 = vpop.f32.mrb[6].mxu1 }
 0x2c8   : > { %v1587_v45 = vpop.f32.mrb[7].mxu1 }
 0x2c9   : > { %v1588_v46 = vadd.f32 %v1587_v45, %v1586_v39 }
 0x2cb   : > { %v1238_v47 = vadd.f32 %v1588_v46, %v1553_v44 }
 0x2d4   : > { %v1307_v9 = vpop.f32.mrb[8].mxu0 }
 0x2d5   : > { %v1308_v49 = vadd.f32 %v1307_v9, %v1238_v47  ;;  %v1663_v50 = vpop.f32.mrb[9].mxu0 }
 0x2d7   : > { %1311 = vst [vmem:[%s347_s9] sm:$0xff] %v1308_v49 }
 0x2d8   : > { %2213 = shalt.err (!%p2210_p10)
}
 0x2d9   : > { %s2214_s2 = scalar_lea.hbm %s2638_s14, 128  ;;  %s2218_s18 = scalar_lea.hbm %s2688_s6, 256 }
 0x2da   : > { %p2215_p13 = scmp.ne.s32.totalorder %s2638_s14, %s2214_s2  ;;  %p2219_p9 = scmp.lt.u32.totalorder %s2638_s14, %s2688_s6 }
 0x2db   : > { %p2220_p3 = scmp.lt.u32.totalorder %s2218_s18, %s2214_s2  ;;  %p2222_p12 = scmp.lt.u32.totalorder %s2214_s2, %s2638_s14 }
 0x2dc   : > { %p2216_p5 = pnand %p2215_p13, %p2712_p2 }
 0x2dd   : > { %p2221_p7 = por %p2220_p3, %p2219_p9 }
 0x2de   : > { %p2217_p11 = pneg %p2216_p5 }
 0x2df   : > { %p2223_p1 = por %p2222_p12, %p2221_p7 }
 0x2e1   : > { %p2224_p4 = pnand %p2223_p1, %p2217_p11 }
 0x2e3   : > { %2227 = shalt.err (!%p2224_p4)
}
 0x2e4   : > { %1983 = dma.vmem_to_hbm [thread:$0]  (%p2712_p2), %s2640_s17, 128, %s2638_s14, %s1313_s7  }
 0x2e5 PF: > { %s1338_s12 = sand.u32 1, %s2266_s21   ;;  %p2713_p0 = scmp.ne.s32.totalorder %s2696_s28, 0 }
 0x2e6   : > { %p2714_p8 = scmp.ge.s32.totalorder %s2278_s24, 2  ;;  %s1339_s10 = scalar_lea.sflag [#allocation4], %s1338_s12 }
 0x2e8   : > { %p2003_p6 = pnand %p2714_p8, %p2713_p0 }
 0x2ea   : > { %2261 = dma.done.wait (!%p2003_p6), %s1339_s10, 128  }
 0x2eb   : > { %2263 = vsyncadd (!%p2003_p6), %s1339_s10, 4294967168  ;;  %p23_p10 = scmp.ge.s32.totalorder %s2459_s11, 4   ;;  %s2715_s21 = smov %s2270_s22 }
 0x2ec   : > { %s2716_s22 = smov %s2274_s23  ;;  %s2717_s23 = smov %s2469_s15 }
 0x2ed   : > { %s2718_s24 = smov %s2459_s11  ;;  %25 = sbr.rel (!%p23_p10) target bundleno = 11 (0xb), region = 114 }
 0x2f4   :  { %1344 = vsyncpa [#allocation3], 1 }
 0x2f5   :  { %1346 = vsyncpa [#allocation3 + $0x1], 1 }
 0x2f6   :  { %1347 = vsyncpa [#allocation6], 1 }
 0x2f7   :  { %1349 = vsyncpa [#allocation6 + $0x1], 1 }
 0x2f8   :  { %1350 = vsyncpa [#allocation9], 1 }
 0x2f9   :  { %1351 = vsyncpa [#allocation4], 1 }
 0x2fa   :  { %1353 = vsyncpa [#allocation4 + $0x1], 1 }

</bundles_post_ra>
